<compile_context>
chip_gen: v6e
topology: v6e:2x2x1
jax: 0.10.0
libtpu: 0.0.40
codegen_flags: <defaults>
</compile_context>

<pallas_src>
import jax
import jax.numpy as jnp
from jax.experimental import pallas as pl
from jax.experimental.pallas import tpu as pltpu

MNIST_IMAGE_SIZE = 28
IN_FEATURES = MNIST_IMAGE_SIZE * MNIST_IMAGE_SIZE  # 784
DISCRIMINATOR_LAYER_SIZES = [128, 256, 512, 1024]  # [3] is unused by the module


def _round_up(n, m):
    return (n + m - 1) // m * m


def _leaky_relu(x, slope=0.2):
    # Identical to torch LeakyReLU(0.2) for 0 < slope < 1; mul+max on the VALU.
    return jnp.maximum(x, slope * x)


def discriminator_kernel(x_ref,
                         w1_ref, b1_ref,
                         w2_ref, b2_ref,
                         w3_ref, b3_ref,
                         w4_ref, b4_ref,
                         o_ref):
    """Fused 4-layer MLP forward for one batch tile.

    x arrives f32 (HBM stream) and is cast to bf16 here; MXU matmuls use bf16
    inputs with f32 accumulation; bias-add / LeakyReLU on the VPU; exp on the EUP;
    the width-1 final layer is a VPU reduction.
    """
    x = x_ref[...].astype(jnp.bfloat16)  # (TB, 784)

    # Layer 1
    h = jnp.dot(x, w1_ref[...], preferred_element_type=jnp.float32) + b1_ref[...]
    h = _leaky_relu(h).astype(jnp.bfloat16)

    # Layer 2 (+ Dropout(p=0) == identity)
    h = jnp.dot(h, w2_ref[...], preferred_element_type=jnp.float32) + b2_ref[...]
    h = _leaky_relu(h).astype(jnp.bfloat16)

    # Layer 3 (+ Dropout(p=0) == identity)
    h = jnp.dot(h, w3_ref[...], preferred_element_type=jnp.float32) + b3_ref[...]
    h = _leaky_relu(h)  # keep f32 for the final reduction

    # Layer 4: output width 1 -> VPU reduction instead of an N=1 MXU matmul.
    logits = jnp.sum(h * w4_ref[...], axis=-1, keepdims=True) + b4_ref[...]

    # Sigmoid: exp hits the EUP; 1/(1+e) with e >= 0 stays exactly in [0, 1].
    o_ref[...] = 1.0 / (1.0 + jnp.exp(-logits))


def discriminator_forward(x_nchw, params, *, block_batch=1024):
    """x_nchw: (B, 1, 28, 28) float32 -> (B, 1) float32."""
    B = x_nchw.shape[0]
    # Free view (contiguous reshape); stays f32 so the kernel only reads 4 B/elem
    # once and casts in VMEM.
    x_flat = x_nchw.reshape(B, IN_FEATURES)

    # Batch tile: multiple of 128 lanes/sublanes-friendly, capped at block_batch,
    # and sized so the grid has >= 2 steps whenever B > 128 (v7x megacore sharding
    # via the "parallel" axis; harmless single-TC on v5e/v6e).
    TB = min(block_batch, _round_up(pl.cdiv(B, 2), 128))
    grid = (pl.cdiv(B, TB),)  # ragged last tile handled by Pallas write masking

    (w1, b1, w2, b2, w3, b3, w4, b4) = params

    const = lambda i: (0, 0)  # weights/biases: same block every step -> DMA'd once

    out = pl.pallas_call(
        discriminator_kernel,
        out_shape=jax.ShapeDtypeStruct((B, 1), jnp.float32),
        grid=grid,
        in_specs=[
            pl.BlockSpec((TB, IN_FEATURES), lambda i: (i, 0)),
            pl.BlockSpec(w1.shape, const), pl.BlockSpec(b1.shape, const),
            pl.BlockSpec(w2.shape, const), pl.BlockSpec(b2.shape, const),
            pl.BlockSpec(w3.shape, const), pl.BlockSpec(b3.shape, const),
            pl.BlockSpec(w4.shape, const), pl.BlockSpec(b4.shape, const),
        ],
        out_specs=pl.BlockSpec((TB, 1), lambda i: (i, 0)),
        compiler_params=pltpu.CompilerParams(
            dimension_semantics=("parallel",)),
    )(x_flat, w1, b1, w2, b2, w3, b3, w4, b4)

    # Matches torch.reshape(x, (batch_size, 1)).
    return out


def init_params(key):
    """Deterministic parameter init (PyTorch-Linear-style uniform bounds).

    Weights for the three MXU layers are stored bf16 (halves HBM traffic, 2x MXU
    throughput); biases stay f32. The final layer's weight is stored f32 as a
    (1, 512) row for the in-kernel VPU reduction.
    """
    dims = [IN_FEATURES,
            DISCRIMINATOR_LAYER_SIZES[0],
            DISCRIMINATOR_LAYER_SIZES[1],
            DISCRIMINATOR_LAYER_SIZES[2],
            1]
    params = []
    for i in range(4):
        fan_in, fan_out = dims[i], dims[i + 1]
        key, kw, kb = jax.random.split(key, 3)
        bound = 1.0 / jnp.sqrt(fan_in)
        # Stored as (in, out) so the kernel does x @ W + b (== x @ W_pt.T + b).
        w = jax.random.uniform(kw, (fan_in, fan_out), jnp.float32, -bound, bound)
        b = jax.random.uniform(kb, (1, fan_out), jnp.float32, -bound, bound)
        if i < 3:
            params += [w.astype(jnp.bfloat16), b]
        else:
            params += [w.reshape(1, fan_in), b]  # (1, 512) f32 row, (1, 1) f32 bias
    return tuple(params)


def reference_forward(x_nchw, params):
    """Pure-JAX reference with the same bf16/f32 mixed precision as the kernel."""
    B = x_nchw.shape[0]
    x = x_nchw.reshape(B, IN_FEATURES).astype(jnp.bfloat16)
    w1, b1, w2, b2, w3, b3, w4, b4 = params
    h = jnp.dot(x, w1, preferred_element_type=jnp.float32) + b1
    h = _leaky_relu(h).astype(jnp.bfloat16)
    h = jnp.dot(h, w2, preferred_element_type=jnp.float32) + b2
    h = _leaky_relu(h).astype(jnp.bfloat16)
    h = jnp.dot(h, w3, preferred_element_type=jnp.float32) + b3
    h = _leaky_relu(h)
    logits = jnp.sum(h * w4, axis=-1, keepdims=True) + b4
    return 1.0 / (1.0 + jnp.exp(-logits))


if __name__ == "__main__":
    key = jax.random.PRNGKey(0)
    key, kx = jax.random.split(key)

    batch_size = 8  # small; also exercises the ragged (B < TB) masked-write path
    x = jax.random.normal(kx, (batch_size, 1, MNIST_IMAGE_SIZE, MNIST_IMAGE_SIZE),
                          dtype=jnp.float32)
    params = init_params(key)

    y = discriminator_forward(x, params)
    y = jax.block_until_ready(y)

    assert y.shape == (batch_size, 1)
    assert bool(jnp.all(jnp.isfinite(y)))
    assert bool(jnp.all((y >= 0.0) & (y <= 1.0)))  # sigmoid range

    y_ref = reference_forward(x, params)
    assert bool(jnp.allclose(y, y_ref, atol=2e-2, rtol=2e-2))

    print("KERNEL_OK")
</pallas_src>

<mosaic_0001>
module attributes {stable_mosaic.version = 11 : i64} {
  func.func @discriminator_kernel(%arg0: i32, %arg1: memref<128x784xf32, #tpu.memory_space<vmem>>, %arg2: memref<784x128xbf16, #tpu.memory_space<vmem>>, %arg3: memref<1x128xf32, #tpu.memory_space<vmem>>, %arg4: memref<128x256xbf16, #tpu.memory_space<vmem>>, %arg5: memref<1x256xf32, #tpu.memory_space<vmem>>, %arg6: memref<256x512xbf16, #tpu.memory_space<vmem>>, %arg7: memref<1x512xf32, #tpu.memory_space<vmem>>, %arg8: memref<1x512xf32, #tpu.memory_space<vmem>>, %arg9: memref<1x1xf32, #tpu.memory_space<vmem>>, %arg10: memref<128x1xf32, #tpu.memory_space<vmem>>) attributes {dimension_semantics = [#tpu.dimension_semantics<parallel>], iteration_bounds = array<i64: 1>, scalar_prefetch = 0 : i64, scratch_operands = 0 : i64, tpu.core_type = #tpu.core_type<tc>, window_params = [{transform_indices = @transform_0, window_bounds = array<i64: 128, 784>}, {pipeline_mode = #tpu.pipeline_mode<synchronous>, transform_indices = @transform_1, window_bounds = array<i64: 784, 128>}, {pipeline_mode = #tpu.pipeline_mode<synchronous>, transform_indices = @transform_2, window_bounds = array<i64: 1, 128>}, {pipeline_mode = #tpu.pipeline_mode<synchronous>, transform_indices = @transform_3, window_bounds = array<i64: 128, 256>}, {pipeline_mode = #tpu.pipeline_mode<synchronous>, transform_indices = @transform_4, window_bounds = array<i64: 1, 256>}, {pipeline_mode = #tpu.pipeline_mode<synchronous>, transform_indices = @transform_5, window_bounds = array<i64: 256, 512>}, {pipeline_mode = #tpu.pipeline_mode<synchronous>, transform_indices = @transform_6, window_bounds = array<i64: 1, 512>}, {pipeline_mode = #tpu.pipeline_mode<synchronous>, transform_indices = @transform_7, window_bounds = array<i64: 1, 512>}, {pipeline_mode = #tpu.pipeline_mode<synchronous>, transform_indices = @transform_8, window_bounds = array<i64: 1, 1>}, {transform_indices = @transform_9, window_bounds = array<i64: 128, 1>}]} {
    %c0 = arith.constant 0 : index
    %c0_0 = arith.constant 0 : index
    %0 = vector.load %arg1[%c0, %c0_0] : memref<128x784xf32, #tpu.memory_space<vmem>>, vector<128x784xf32>
    %1 = arith.truncf %0 : vector<128x784xf32> to vector<128x784xbf16>
    %c0_1 = arith.constant 0 : index
    %c0_2 = arith.constant 0 : index
    %2 = vector.load %arg2[%c0_1, %c0_2] : memref<784x128xbf16, #tpu.memory_space<vmem>>, vector<784x128xbf16>
    %cst = arith.constant dense<0.000000e+00> : vector<128x128xf32>
    %3 = tpu.matmul %1, %2, %cst {dimension_numbers = #tpu.dot_dimension_numbers<[1], [0], [0], [1], [0, 0, 1, 1], [], []>} : vector<128x784xbf16>, vector<784x128xbf16>, vector<128x128xf32> -> vector<128x128xf32>
    %c0_3 = arith.constant 0 : index
    %c0_4 = arith.constant 0 : index
    %4 = vector.load %arg3[%c0_3, %c0_4] : memref<1x128xf32, #tpu.memory_space<vmem>>, vector<1x128xf32>
    %5 = vector.broadcast %4 : vector<1x128xf32> to vector<128x128xf32>
    %6 = arith.addf %3, %5 : vector<128x128xf32>
    %cst_5 = arith.constant 2.000000e-01 : f32
    %7 = vector.broadcast %cst_5 : f32 to vector<128x128xf32>
    %8 = arith.mulf %7, %6 : vector<128x128xf32>
    %9 = arith.maximumf %6, %8 : vector<128x128xf32>
    %10 = arith.truncf %9 : vector<128x128xf32> to vector<128x128xbf16>
    %c0_6 = arith.constant 0 : index
    %c0_7 = arith.constant 0 : index
    %11 = vector.load %arg4[%c0_6, %c0_7] : memref<128x256xbf16, #tpu.memory_space<vmem>>, vector<128x256xbf16>
    %cst_8 = arith.constant dense<0.000000e+00> : vector<128x256xf32>
    %12 = tpu.matmul %10, %11, %cst_8 {dimension_numbers = #tpu.dot_dimension_numbers<[1], [0], [0], [1], [0, 0, 1, 1], [], []>} : vector<128x128xbf16>, vector<128x256xbf16>, vector<128x256xf32> -> vector<128x256xf32>
    %c0_9 = arith.constant 0 : index
    %c0_10 = arith.constant 0 : index
    %13 = vector.load %arg5[%c0_9, %c0_10] : memref<1x256xf32, #tpu.memory_space<vmem>>, vector<1x256xf32>
    %14 = vector.broadcast %13 : vector<1x256xf32> to vector<128x256xf32>
    %15 = arith.addf %12, %14 : vector<128x256xf32>
    %cst_11 = arith.constant 2.000000e-01 : f32
    %16 = vector.broadcast %cst_11 : f32 to vector<128x256xf32>
    %17 = arith.mulf %16, %15 : vector<128x256xf32>
    %18 = arith.maximumf %15, %17 : vector<128x256xf32>
    %19 = arith.truncf %18 : vector<128x256xf32> to vector<128x256xbf16>
    %c0_12 = arith.constant 0 : index
    %c0_13 = arith.constant 0 : index
    %20 = vector.load %arg6[%c0_12, %c0_13] : memref<256x512xbf16, #tpu.memory_space<vmem>>, vector<256x512xbf16>
    %cst_14 = arith.constant dense<0.000000e+00> : vector<128x512xf32>
    %21 = tpu.matmul %19, %20, %cst_14 {dimension_numbers = #tpu.dot_dimension_numbers<[1], [0], [0], [1], [0, 0, 1, 1], [], []>} : vector<128x256xbf16>, vector<256x512xbf16>, vector<128x512xf32> -> vector<128x512xf32>
    %c0_15 = arith.constant 0 : index
    %c0_16 = arith.constant 0 : index
    %22 = vector.load %arg7[%c0_15, %c0_16] : memref<1x512xf32, #tpu.memory_space<vmem>>, vector<1x512xf32>
    %23 = vector.broadcast %22 : vector<1x512xf32> to vector<128x512xf32>
    %24 = arith.addf %21, %23 : vector<128x512xf32>
    %cst_17 = arith.constant 2.000000e-01 : f32
    %25 = vector.broadcast %cst_17 : f32 to vector<128x512xf32>
    %26 = arith.mulf %25, %24 : vector<128x512xf32>
    %27 = arith.maximumf %24, %26 : vector<128x512xf32>
    %c0_18 = arith.constant 0 : index
    %c0_19 = arith.constant 0 : index
    %28 = vector.load %arg8[%c0_18, %c0_19] : memref<1x512xf32, #tpu.memory_space<vmem>>, vector<1x512xf32>
    %29 = vector.broadcast %28 : vector<1x512xf32> to vector<128x512xf32>
    %30 = arith.mulf %27, %29 : vector<128x512xf32>
    %cst_20 = arith.constant dense<0.000000e+00> : vector<128xf32>
    %31 = vector.multi_reduction <add>, %30, %cst_20 [1] : vector<128x512xf32> to vector<128xf32>
    %32 = vector.shape_cast %31 : vector<128xf32> to vector<128x1xf32>
    %c0_21 = arith.constant 0 : index
    %c0_22 = arith.constant 0 : index
    %33 = vector.load %arg9[%c0_21, %c0_22] : memref<1x1xf32, #tpu.memory_space<vmem>>, vector<1x1xf32>
    %34 = vector.broadcast %33 : vector<1x1xf32> to vector<128x1xf32>
    %35 = arith.addf %32, %34 : vector<128x1xf32>
    %cst_23 = arith.constant 0.000000e+00 : f32
    %36 = vector.broadcast %cst_23 : f32 to vector<128x1xf32>
    %37 = arith.subf %36, %35 : vector<128x1xf32>
    %38 = math.exp %37 : vector<128x1xf32>
    %cst_24 = arith.constant 1.000000e+00 : f32
    %39 = vector.broadcast %cst_24 : f32 to vector<128x1xf32>
    %40 = arith.addf %39, %38 : vector<128x1xf32>
    %cst_25 = arith.constant 1.000000e+00 : f32
    %41 = vector.broadcast %cst_25 : f32 to vector<128x1xf32>
    %42 = arith.divf %41, %40 : vector<128x1xf32>
    %c0_26 = arith.constant 0 : index
    %c0_27 = arith.constant 0 : index
    %43 = vector.load %arg10[%c0_26, %c0_27] : memref<128x1xf32, #tpu.memory_space<vmem>>, vector<128x1xf32>
    tpu.vector_store %arg10[%c0_26, %c0_27], %42 {strides = array<i32>} : memref<128x1xf32, #tpu.memory_space<vmem>>, vector<128x1xf32>,
    return
  }
  func.func @transform_0(%arg0: i32) -> (i32, i32) {
    %c0_i32 = arith.constant 0 : i32
    %c0_i32_0 = arith.constant 0 : i32
    return %arg0, %c0_i32 : i32, i32
  }
  func.func @transform_1(%arg0: i32) -> (i32, i32) {
    %c0_i32 = arith.constant 0 : i32
    %c0_i32_0 = arith.constant 0 : i32
    %c0_i32_1 = arith.constant 0 : i32
    return %c0_i32, %c0_i32_0 : i32, i32
  }
  func.func @transform_2(%arg0: i32) -> (i32, i32) {
    %c0_i32 = arith.constant 0 : i32
    %c0_i32_0 = arith.constant 0 : i32
    %c0_i32_1 = arith.constant 0 : i32
    return %c0_i32, %c0_i32_0 : i32, i32
  }
  func.func @transform_3(%arg0: i32) -> (i32, i32) {
    %c0_i32 = arith.constant 0 : i32
    %c0_i32_0 = arith.constant 0 : i32
    %c0_i32_1 = arith.constant 0 : i32
    return %c0_i32, %c0_i32_0 : i32, i32
  }
  func.func @transform_4(%arg0: i32) -> (i32, i32) {
    %c0_i32 = arith.constant 0 : i32
    %c0_i32_0 = arith.constant 0 : i32
    %c0_i32_1 = arith.constant 0 : i32
    return %c0_i32, %c0_i32_0 : i32, i32
  }
  func.func @transform_5(%arg0: i32) -> (i32, i32) {
    %c0_i32 = arith.constant 0 : i32
    %c0_i32_0 = arith.constant 0 : i32
    %c0_i32_1 = arith.constant 0 : i32
    return %c0_i32, %c0_i32_0 : i32, i32
  }
  func.func @transform_6(%arg0: i32) -> (i32, i32) {
    %c0_i32 = arith.constant 0 : i32
    %c0_i32_0 = arith.constant 0 : i32
    %c0_i32_1 = arith.constant 0 : i32
    return %c0_i32, %c0_i32_0 : i32, i32
  }
  func.func @transform_7(%arg0: i32) -> (i32, i32) {
    %c0_i32 = arith.constant 0 : i32
    %c0_i32_0 = arith.constant 0 : i32
    %c0_i32_1 = arith.constant 0 : i32
    return %c0_i32, %c0_i32_0 : i32, i32
  }
  func.func @transform_8(%arg0: i32) -> (i32, i32) {
    %c0_i32 = arith.constant 0 : i32
    %c0_i32_0 = arith.constant 0 : i32
    %c0_i32_1 = arith.constant 0 : i32
    return %c0_i32, %c0_i32_0 : i32, i32
  }
  func.func @transform_9(%arg0: i32) -> (i32, i32) {
    %c0_i32 = arith.constant 0 : i32
    %c0_i32_0 = arith.constant 0 : i32
    return %arg0, %c0_i32 : i32, i32
  }
}

</mosaic_0001>

<bundles_post_ra>
// kernel: tpu_custom_call.1
= control target key start
LH: loop header
LB: loop body
LE: loop exit
PB: predicated region body
PF: predicated region fallthrough
CT: control target
= control target key end

     0   :  { %s4038_s0 = inlined_call_operand.hbm [shape: f32[8,784], index: 0, kind: input, shape index: {}]   ;;  %s4039_s1 = inlined_call_operand.hbm [shape: bf16[784,128], index: 1, kind: input, shape index: {}]   ;;  %s4040_s2 = inlined_call_operand.vmem [shape: f32[1,128], index: 2, kind: input, shape index: {}]   ;;  %s4041_s3 = inlined_call_operand.hbm [shape: bf16[128,256], index: 3, kind: input, shape index: {}]   ;;  %s4042_s4 = inlined_call_operand.hbm [shape: f32[1,256], index: 4, kind: input, shape index: {}]   ;;  %s4043_s5 = inlined_call_operand.hbm [shape: bf16[256,512], index: 5, kind: input, shape index: {}]   ;;  %s4044_s6 = inlined_call_operand.vmem [shape: f32[1,512], index: 6, kind: input, shape index: {}]   ;;  %s4045_s7 = inlined_call_operand.vmem [shape: f32[1,512], index: 7, kind: input, shape index: {}]   ;;  %s4046_s8 = inlined_call_operand.<no memory space> [shape: f32[1,1], index: 8, kind: input, shape index: {}]   ;;  %s4047_s9 = inlined_call_operand.vmem [shape: f32[8,1], index: 9, kind: output, shape index: {}]  }
   0x1   :  { %v14_v0 = vstv %s4046_s8 }
   0x2   :  { %15 = vst [vmem:[#allocation2] sm:$0x1] %v14_v0 }
   0x3   :  { %16 = vsyncpa [#allocation4], 0 }
   0x4   :  { %17 = vsyncpa [#allocation6], 0 }
   0x5   :  { %18 = vsyncpa [#allocation9], 0 }
   0x6   :  { %23 = vsyncadd [#allocation4], 13440  ;;  %s3271_s11 = smov [#allocation5]  }
   0x7   :  { %s36_s12 = sshll.u32 %s3271_s11, 4  ;;  %s37_s12 = int_to_ptr.vmem [resolvable:$true] %s36_s12 }
   0x8   :  { %s3173_s13 = scalar_lea.vmem %s37_s12, 6272  ;;  %p3178_p1 = scmp.lt.s32.totalorder %s37_s12, %s37_s12 }
   0x9   :  { %p3174_p0 = scmp.ne.s32.totalorder %s37_s12, %s3173_s13  ;;  %p3179_p2 = scmp.lt.s32.totalorder %s3173_s13, %s3173_s13 }
   0xb   :  { %p3180_p3 = por %p3179_p2, %p3178_p1 }
   0xd   :  { %p3181_p4 = pnand %p3180_p3, %p3174_p0 }
   0xf   :  { %3184 = shalt.err (!%p3181_p4)
}
  0x10   :  { %s3272_s14 = smov 64   ;;  %s3273_s15 = smov 4  }
  0x11   :  { %42 = dma.hbm_to_vmem [thread:$0]  %s4039_s1, 6272, %s37_s12, [#allocation6], %s3272_s14, %s3272_s14, %s3273_s15  }
  0x12   :  { %s3274_s8 = smov [#allocation8]   ;;  %s3275_s19 = smov [#allocation3]  }
  0x13   :  { %s63_s18 = sshll.u32 %s3274_s8, 4  ;;  %s24_s20 = sshll.u32 %s3275_s19, 4  ;;  %s64_s18 = int_to_ptr.vmem [resolvable:$true] %s63_s18  ;;  %s25_s20 = int_to_ptr.vmem [resolvable:$true] %s24_s20 }
  0x14   :  { %s3193_s21 = scalar_lea.vmem %s64_s18, 32  ;;  %p3198_p6 = scmp.lt.s32.totalorder %s64_s18, %s64_s18 }
  0x15   :  { %p3194_p5 = scmp.ne.s32.totalorder %s64_s18, %s3193_s21  ;;  %p3199_p7 = scmp.lt.s32.totalorder %s3193_s21, %s3193_s21 }
  0x17   :  { %p3200_p8 = por %p3199_p7, %p3198_p6 }
  0x19   :  { %p3201_p9 = pnand %p3200_p8, %p3194_p5 }
  0x1b   :  { %3204 = shalt.err (!%p3201_p9)
}
  0x1c   :  { %66 = dma.hbm_to_vmem [thread:$0]  %s4042_s4, 32, %s64_s18, [#allocation9]  }
  0x1d   :  { %s3213_s24 = scalar_lea.vmem %s25_s20, 896  ;;  %s3217_s1 = scalar_lea.vmem %s25_s20, 14336 }
  0x1e   :  { %p3214_p10 = scmp.ne.s32.totalorder %s25_s20, %s3213_s24  ;;  %p3218_p11 = scmp.lt.s32.totalorder %s25_s20, %s25_s20 }
  0x1f   :  { %p3219_p12 = scmp.lt.s32.totalorder %s3217_s1, %s3213_s24 }
  0x21   :  { %p3220_p13 = por %p3219_p12, %p3218_p11 }
  0x23   :  { %p3221_p0 = pnand %p3220_p13, %p3214_p10 }
  0x25   :  { %3224 = shalt.err (!%p3221_p0)
}
  0x26   :  { %s3276_s25 = smov 896   ;;  %s3277_s26 = smov 56  }
  0x27   :  { %30 = dma.hbm_to_vmem [thread:$0]  %s4038_s0, 896, %s25_s20, [#allocation4], %s3276_s25, %s3276_s25, %s3277_s26  }
  0x28   :  { %s3278_s29 = smov [#allocation7]  }
  0x29   :  { %s50_s30 = sshll.u32 %s3278_s29, 4  ;;  %s51_s30 = int_to_ptr.vmem [resolvable:$true] %s50_s30 }
  0x2a   :  { %s3233_s10 = scalar_lea.vmem %s51_s30, 2048  ;;  %p3238_p2 = scmp.lt.s32.totalorder %s51_s30, %s51_s30 }
  0x2b   :  { %p3234_p1 = scmp.ne.s32.totalorder %s51_s30, %s3233_s10  ;;  %p3239_p3 = scmp.lt.s32.totalorder %s3233_s10, %s3233_s10 }
  0x2d   :  { %p3240_p4 = por %p3239_p3, %p3238_p2 }
  0x2f   :  { %p3241_p5 = pnand %p3240_p4, %p3234_p1 }
  0x31   :  { %3244 = shalt.err (!%p3241_p5)
}
  0x32   :  { %s3279_s4 = smov 128   ;;  %s3280_s11 = smov 8  }
  0x33   :  { %56 = dma.hbm_to_vmem [thread:$0]  %s4041_s3, 2048, %s51_s30, [#allocation6], %s3279_s4, %s3279_s4, %s3280_s11  }
  0x34   :  { %s3281_s14 = smov [#allocation10]  }
  0x35   :  { %s72_s15 = sshll.u32 %s3281_s14, 4  ;;  %s73_s15 = int_to_ptr.vmem [resolvable:$true] %s72_s15 }
  0x36   :  { %s3253_s0 = scalar_lea.vmem %s73_s15, 8192  ;;  %p3258_p7 = scmp.lt.s32.totalorder %s73_s15, %s73_s15 }
  0x37   :  { %p3254_p6 = scmp.ne.s32.totalorder %s73_s15, %s3253_s0  ;;  %p3259_p8 = scmp.lt.s32.totalorder %s3253_s0, %s3253_s0 }
  0x39   :  { %p3260_p9 = por %p3259_p8, %p3258_p7 }
  0x3b   :  { %p3261_p10 = pnand %p3260_p9, %p3254_p6 }
  0x3d   :  { %3264 = shalt.err (!%p3261_p10)
}
  0x3e   :  { %s3282_s16 = smov 256   ;;  %s3283_s17 = smov 16  }
  0x3f   :  { %78 = dma.hbm_to_vmem [thread:$0]  %s4043_s5, 8192, %s73_s15, [#allocation9], %s3282_s16, %s3282_s16, %s3283_s17  }
  0x40   :  { %3265 = dma.done.wait [#allocation4], 14336  }
  0x41   :  { %3266 = vsyncadd [#allocation4], 4294952960 }
  0x42   :  { %3267 = dma.done.wait [#allocation6], 8320  }
  0x43   :  { %3268 = vsyncadd [#allocation6], 4294958976 }
  0x44   :  { %3269 = dma.done.wait [#allocation9], 8224  }
  0x45   :  { %3270 = vsyncadd [#allocation9], 4294959072  ;;  %v2932_v1 = vld [vmem:[#allocation5 + $0x78] sm:$0xff]   ;;  %v2936_v5 = vld [vmem:[#allocation5 + $0x70] sm:$0xff]   ;;  %vm668_vm0 = vcmask 130048   ;;  %vm2467_vm1 = vcmask 7168  }
  0x46   :  { %v2933_v2 = vld [vmem:[#allocation5 + $0xf8] sm:$0xff]   ;;  %2667 = vmatprep.subr.bf16.mxu0 %v2932_v1  ;;  %v2937_v6 = vld [vmem:[#allocation5 + $0xf0] sm:$0xff]   ;;  %v2940_v9 = vld [vmem:[#allocation5 + $0x68] sm:$0xff]  }
  0x47   :  { %v2934_v3 = vld [vmem:[#allocation5 + $0x38] sm:$0xff]   ;;  %2731 = vmatprep.subr.bf16.mxu1 %v2933_v2  ;;  %v2938_v7 = vld [vmem:[#allocation5 + $0x30] sm:$0xff]   ;;  %v2941_v10 = vld [vmem:[#allocation5 + $0xe8] sm:$0xff]  }
  0x48   :  { %v2935_v4 = vld [vmem:[#allocation5 + $0xb8] sm:$0xff]   ;;  %2668 = vmatpush3.bf16.msra.mxu0 %v2934_v3  ;;  %v2939_v8 = vld [vmem:[#allocation5 + $0xb0] sm:$0xff]   ;;  %v2942_v11 = vld [vmem:[#allocation5 + $0x28] sm:$0xff]  }
  0x49   :  { %2732 = vmatpush3.bf16.msra.mxu1 %v2935_v4  ;;  %2669 = vmatprep.subr.bf16.mxu0 %v2936_v5  ;;  %v2943_v12 = vld [vmem:[#allocation5 + $0xa8] sm:$0xff]   ;;  %v2944_v13 = vld [vmem:[#allocation5 + $0x60] sm:$0xff]   ;;  %v2948_v17 = vld [vmem:[#allocation5 + $0x58] sm:$0xff]  }
  0x4a   :  { %2733 = vmatprep.subr.bf16.mxu1 %v2937_v6  ;;  %v2945_v14 = vld [vmem:[#allocation5 + $0xe0] sm:$0xff]   ;;  %v2949_v18 = vld [vmem:[#allocation5 + $0xd8] sm:$0xff]   ;;  %v2952_v21 = vld [vmem:[#allocation5 + $0x50] sm:$0xff]  }
  0x4b   :  { %v2946_v15 = vld [vmem:[#allocation5 + $0x20] sm:$0xff]   ;;  %v2950_v19 = vld [vmem:[#allocation5 + $0x18] sm:$0xff]   ;;  %v2953_v22 = vld [vmem:[#allocation5 + $0xd0] sm:$0xff]  }
  0x4c   :  { %2670 = vmatpush3.bf16.msra.mxu0 %v2938_v7  ;;  %v2947_v16 = vld [vmem:[#allocation5 + $0xa0] sm:$0xff]   ;;  %v2951_v20 = vld [vmem:[#allocation5 + $0x98] sm:$0xff]   ;;  %v2954_v23 = vld [vmem:[#allocation5 + $0x10] sm:$0xff]  }
  0x4d   :  { %2734 = vmatpush3.bf16.msra.mxu1 %v2939_v8  ;;  %2671 = vmatprep.subr.bf16.mxu0 %v2940_v9  ;;  %v2955_v24 = vld [vmem:[#allocation5 + $0x90] sm:$0xff]   ;;  %v2956_v25 = vld [vmem:[#allocation5 + $0x48] sm:$0xff]   ;;  %v2960_v29 = vld [vmem:[#allocation5 + $0x40] sm:$0xff]  }
  0x4e   :  { %2735 = vmatprep.subr.bf16.mxu1 %v2941_v10  ;;  %v2957_v26 = vld [vmem:[#allocation5 + $0xc8] sm:$0xff]   ;;  %v2961_v30 = vld [vmem:[#allocation5 + $0xc0] sm:$0xff]   ;;  %v104_v35 = vld [vmem:[#allocation3 + $0x18] sm:$0xff] }
  0x4f   :  { %v2958_v27 = vld [vmem:[#allocation5 + $0x8] sm:$0xff]   ;;  %v2962_v31 = vld [vmem:[#allocation5] sm:$0xff]   ;;  %v111_v37 = vld [vmem:[#allocation3 + $0x50] sm:$0xff] }
  0x50   :  { %2672 = vmatpush3.bf16.msra.mxu0 %v2942_v11  ;;  %v2959_v28 = vld [vmem:[#allocation5 + $0x88] sm:$0xff]   ;;  %v2963_v32 = vld [vmem:[#allocation5 + $0x80] sm:$0xff]   ;;  %v108_v39 = vld [vmem:[#allocation3 + $0x38] sm:$0xff]  ;;  %v216_v40 = vpack.c.bf16 %v111_v37, %v104_v35 }
  0x51   :  { %2736 = vmatpush3.bf16.msra.mxu1 %v2943_v12  ;;  %2673 = vmatprep.subr.bf16.mxu0 %v2944_v13  ;;  %v102_v33 = vld [vmem:[#allocation3 + $0x8] sm:$0xff]  ;;  %v109_v34 = vld [vmem:[#allocation3 + $0x40] sm:$0xff]  ;;  %v103_v42 = vld [vmem:[#allocation3 + $0x10] sm:$0xff] }
  0x52   :  { %2737 = vmatprep.subr.bf16.mxu1 %v2945_v14  ;;  %v214_v36 = vpack.c.bf16 %v109_v34, %v102_v33  ;;  %v101_v38 = vld [vmem:[#allocation3] sm:$0xff]  ;;  %v110_v43 = vld [vmem:[#allocation3 + $0x48] sm:$0xff]  ;;  %v2964_v45 = vld [vmem:[#allocation5 + $0x178] sm:$0xff]   ;;  %822 = vmatprep.mubr.bf16.mxu1 %v216_v40 }
  0x53   :  { %v213_v41 = vpack.c.bf16 %v108_v39, %v101_v38  ;;  %v215_v44 = vpack.c.bf16 %v110_v43, %v103_v42  ;;  %v2965_v46 = vld [vmem:[#allocation5 + $0x138] sm:$0xff]   ;;  %v2966_v47 = vld [vmem:[#allocation5 + $0x180] sm:$0xff]   ;;  %v123_v49 = vld [vmem:[#allocation3 + $0xb0] sm:$0xff] }
  0x54   :  { %2674 = vmatpush3.bf16.msra.mxu0 %v2946_v15  ;;  %725 = vmatprep.mubr.bf16.mxu0 %v214_v36  ;;  %v116_v48 = vld [vmem:[#allocation3 + $0x78] sm:$0xff]  ;;  %v118_v50 = vld [vmem:[#allocation3 + $0x88] sm:$0xff]  ;;  %v125_v51 = vld [vmem:[#allocation3 + $0xc0] sm:$0xff] }
  0x55   :  { %2738 = vmatpush3.bf16.msra.mxu1 %v2947_v16  ;;  %2675 = vmatprep.subr.bf16.mxu0 %v2948_v17  ;;  %v221_v52 = vpack.c.bf16 %v123_v49, %v116_v48  ;;  %v223_v53 = vpack.c.bf16 %v125_v51, %v118_v50  ;;  %v115_v54 = vld [vmem:[#allocation3 + $0x70] sm:$0xff]  ;;  %v122_v55 = vld [vmem:[#allocation3 + $0xa8] sm:$0xff]  ;;  %v117_v56 = vld [vmem:[#allocation3 + $0x80] sm:$0xff] }
  0x56   :  { %2739 = vmatprep.subr.bf16.mxu1 %v2949_v18  ;;  %v220_v57 = vpack.c.bf16 %v122_v55, %v115_v54  ;;  %v124_v58 = vld [vmem:[#allocation3 + $0xb8] sm:$0xff]  ;;  %v2967_v60 = vld [vmem:[#allocation5 + $0x170] sm:$0xff]   ;;  %v130_v62 = vld [vmem:[#allocation3 + $0xe8] sm:$0xff] }
  0x57   :  { %v222_v59 = vpack.c.bf16 %v124_v58, %v117_v56  ;;  %v2968_v61 = vld [vmem:[#allocation5 + $0x130] sm:$0xff]   ;;  %v137_v63 = vld [vmem:[#allocation3 + $0x120] sm:$0xff]  ;;  %v132_v1 = vld [vmem:[#allocation3 + $0xf8] sm:$0xff] }
  0x58   :  { %2676 = vmatpush3.bf16.msra.mxu0 %v2950_v19  ;;  %v228_v0 = vpack.c.bf16 %v137_v63, %v130_v62  ;;  %v139_v2 = vld [vmem:[#allocation3 + $0x130] sm:$0xff]  ;;  %v129_v3 = vld [vmem:[#allocation3 + $0xe0] sm:$0xff]  ;;  %v136_v5 = vld [vmem:[#allocation3 + $0x118] sm:$0xff] }
  0x59   :  { %2740 = vmatpush3.bf16.msra.mxu1 %v2951_v20  ;;  %2677 = vmatprep.subr.bf16.mxu0 %v2952_v21  ;;  %v230_v4 = vpack.c.bf16 %v139_v2, %v132_v1  ;;  %v131_v6 = vld [vmem:[#allocation3 + $0xf0] sm:$0xff]  ;;  %v138_v7 = vld [vmem:[#allocation3 + $0x128] sm:$0xff]  ;;  %v144_v10 = vld [vmem:[#allocation3 + $0x158] sm:$0xff]  ;;  %v227_v13 = vpack.c.bf16 %v136_v5, %v129_v3 }
  0x5a   :  { %2741 = vmatprep.subr.bf16.mxu1 %v2953_v22  ;;  %v2969_v8 = vld [vmem:[#allocation5 + $0x168] sm:$0xff]   ;;  %v151_v11 = vld [vmem:[#allocation3 + $0x190] sm:$0xff]  ;;  %v153_v14 = vld [vmem:[#allocation3 + $0x1a0] sm:$0xff]  ;;  %v229_v15 = vpack.c.bf16 %v138_v7, %v131_v6 }
  0x5b   :  { %v2970_v9 = vld [vmem:[#allocation5 + $0x128] sm:$0xff]   ;;  %v235_v16 = vpack.c.bf16 %v151_v11, %v144_v10  ;;  %v2971_v18 = vld [vmem:[#allocation5 + $0x160] sm:$0xff]   ;;  %v143_v19 = vld [vmem:[#allocation3 + $0x150] sm:$0xff] }
  0x5c   :  { %2678 = vmatpush3.bf16.msra.mxu0 %v2954_v23  ;;  %v146_v12 = vld [vmem:[#allocation3 + $0x168] sm:$0xff]  ;;  %v2972_v20 = vld [vmem:[#allocation5 + $0x120] sm:$0xff]   ;;  %v152_v23 = vld [vmem:[#allocation3 + $0x198] sm:$0xff] }
  0x5d   :  { %2742 = vmatpush3.bf16.msra.mxu1 %v2955_v24  ;;  %2679 = vmatprep.subr.bf16.mxu0 %v2956_v25  ;;  %v237_v17 = vpack.c.bf16 %v153_v14, %v146_v12  ;;  %v150_v21 = vld [vmem:[#allocation3 + $0x188] sm:$0xff]  ;;  %v145_v22 = vld [vmem:[#allocation3 + $0x160] sm:$0xff]  ;;  %v2975_v34 = vld [vmem:[#allocation5 + $0x150] sm:$0xff]  }
  0x5e   :  { %2743 = vmatprep.subr.bf16.mxu1 %v2957_v26  ;;  %v158_v24 = vld [vmem:[#allocation3 + $0x1c8] sm:$0xff]  ;;  %v165_v25 = vld [vmem:[#allocation3 + $0x200] sm:$0xff]  ;;  %v160_v26 = vld [vmem:[#allocation3 + $0x1d8] sm:$0xff] }
  0x5f   :  { %v2976_v35 = vld [vmem:[#allocation5 + $0x110] sm:$0xff]   ;;  %v157_v36 = vld [vmem:[#allocation3 + $0x1c0] sm:$0xff]  ;;  %v164_v37 = vld [vmem:[#allocation3 + $0x1f8] sm:$0xff] }
  0x60   :  { %2680 = vmatpush3.bf16.msra.mxu0 %v2958_v27  ;;  %v167_v27 = vld [vmem:[#allocation3 + $0x210] sm:$0xff]  ;;  %v166_v39 = vld [vmem:[#allocation3 + $0x208] sm:$0xff]  ;;  %v172_v40 = vld [vmem:[#allocation3 + $0x238] sm:$0xff] }
  0x61   :  { %2744 = vmatpush3.bf16.msra.mxu1 %v2959_v28  ;;  %2681 = vmatprep.subr.bf16.mxu0 %v2960_v29  ;;  %v2973_v28 = vld [vmem:[#allocation5 + $0x158] sm:$0xff]   ;;  %v234_v29 = vpack.c.bf16 %v150_v21, %v143_v19  ;;  %v244_v33 = vpack.c.bf16 %v167_v27, %v160_v26  ;;  %v159_v38 = vld [vmem:[#allocation3 + $0x1d0] sm:$0xff]  ;;  %v174_v42 = vld [vmem:[#allocation3 + $0x248] sm:$0xff] }
  0x62   :  { %2745 = vmatprep.subr.bf16.mxu1 %v2961_v30  ;;  %v2974_v30 = vld [vmem:[#allocation5 + $0x118] sm:$0xff]   ;;  %v181_v43 = vld [vmem:[#allocation3 + $0x280] sm:$0xff]  ;;  %v2978_v48 = vld [vmem:[#allocation5 + $0x108] sm:$0xff]  }
  0x63   :  { %v251_v49 = vpack.c.bf16 %v181_v43, %v174_v42  ;;  %v171_v50 = vld [vmem:[#allocation3 + $0x230] sm:$0xff]  ;;  %v178_v51 = vld [vmem:[#allocation3 + $0x268] sm:$0xff]  ;;  %v2979_v54 = vld [vmem:[#allocation5 + $0x140] sm:$0xff]  }
  0x64   :  { %2682 = vmatpush3.bf16.msra.mxu0 %v2962_v31  ;;  %v236_v31 = vpack.c.bf16 %v152_v23, %v145_v22  ;;  %v186_v55 = vld [vmem:[#allocation3 + $0x2a8] sm:$0xff]  ;;  %v193_v56 = vld [vmem:[#allocation3 + $0x2e0] sm:$0xff]  ;;  %v188_v58 = vld [vmem:[#allocation3 + $0x2b8] sm:$0xff] }
  0x65   :  { %2746 = vmatpush3.bf16.msra.mxu1 %v2963_v32  ;;  %2795 = vmatprep.subr.bf16.mxu0 %v2964_v45  ;;  %v242_v32 = vpack.c.bf16 %v165_v25, %v158_v24  ;;  %v2977_v45 = vld [vmem:[#allocation5 + $0x148] sm:$0xff]   ;;  %v256_v62 = vpack.c.bf16 %v193_v56, %v186_v55  ;;  %v192_v1 = vld [vmem:[#allocation3 + $0x2d8] sm:$0xff]  ;;  %v187_v2 = vld [vmem:[#allocation3 + $0x2b0] sm:$0xff] }
  0x66   :  { %2868 = vmatprep.subr.bf16.mxu1 %v2966_v47  ;;  %v194_v3 = vld [vmem:[#allocation3 + $0x2e8] sm:$0xff]  ;;  %v207_v5 = vld [vmem:[#allocation3 + $0x350] sm:$0xff]  ;;  %v209_v7 = vld [vmem:[#allocation3 + $0x360] sm:$0xff] }
  0x67   :  { %726 = vmatmul.mubr.bf16.vlgmr.msra.gmra.mxu0 %v213_v41  ;;  %v179_v41 = vld [vmem:[#allocation3 + $0x270] sm:$0xff]  ;;  %v202_v6 = vld [vmem:[#allocation3 + $0x328] sm:$0xff]  ;;  %v201_v14 = vld [vmem:[#allocation3 + $0x320] sm:$0xff] }
  0x68   :  { %823 = vmatmul.mubr.bf16.vlgmr.msra.gmra.mxu1 %v215_v44  ;;  %2796 = vmatpush3.bf16.msra.mxu0 %v2965_v46  ;;  %v241_v44 = vpack.c.bf16 %v164_v37, %v157_v36  ;;  %v243_v46 = vpack.c.bf16 %v166_v39, %v159_v38  ;;  %v265_v11 = vpack.c.bf16 %v209_v7, %v202_v6  ;;  %v199_v12 = vld [vmem:[#allocation3 + $0x310] sm:$0xff]  ;;  %v114_v19 = vld [vmem:[#allocation3 + $0x68] sm:$0xff]  ;;  %v105_v24 = vld [vmem:[#allocation3 + $0x20] sm:$0xff] }
  0x69   :  { %2869 = vmatpush3.bf16.msra.mxu1 %v2966_v47  ;;  %733 = vmatprep.mubr.bf16.mxu0 %v221_v52  ;;  %v249_v47 = vpack.c.bf16 %v179_v41, %v172_v40  ;;  %v173_v52 = vld [vmem:[#allocation3 + $0x240] sm:$0xff]  ;;  %v112_v25 = vld [vmem:[#allocation3 + $0x58] sm:$0xff]  ;;  %v119_v36 = vld [vmem:[#allocation3 + $0x90] sm:$0xff] }
  0x6a   :  { %830 = vmatprep.mubr.bf16.mxu1 %v223_v53  ;;  %2797 = vmatprep.subr.bf16.mxu0 %v2967_v60  ;;  %v180_v53 = vld [vmem:[#allocation3 + $0x278] sm:$0xff]  ;;  %v248_v60 = vpack.c.bf16 %v178_v51, %v171_v50  ;;  %v121_v26 = vld [vmem:[#allocation3 + $0xa0] sm:$0xff]  ;;  %v126_v37 = vld [vmem:[#allocation3 + $0xc8] sm:$0xff] }
  0x6b   :  { %v128_v27 = vld [vmem:[#allocation3 + $0xd8] sm:$0xff]  ;;  %v134_v38 = vld [vmem:[#allocation3 + $0x108] sm:$0xff]  ;;  %v141_v39 = vld [vmem:[#allocation3 + $0x140] sm:$0xff] }
  0x6c   :  { %2798 = vmatpush3.bf16.msra.mxu0 %v2968_v61  ;;  %v250_v61 = vpack.c.bf16 %v180_v53, %v173_v52  ;;  %v149_v40 = vld [vmem:[#allocation3 + $0x180] sm:$0xff]  ;;  %v156_v41 = vld [vmem:[#allocation3 + $0x1b8] sm:$0xff]  ;;  %v163_v42 = vld [vmem:[#allocation3 + $0x1f0] sm:$0xff] }
  0x6d   :  { %2799 = vmatprep.subr.bf16.mxu0 %v2969_v8  ;;  %v170_v43 = vld [vmem:[#allocation3 + $0x228] sm:$0xff]  ;;  %v148_v50 = vld [vmem:[#allocation3 + $0x178] sm:$0xff]  ;;  %v155_v51 = vld [vmem:[#allocation3 + $0x1b0] sm:$0xff] }
  0x6e   :  { %v177_v52 = vld [vmem:[#allocation3 + $0x260] sm:$0xff]  ;;  %v184_v53 = vld [vmem:[#allocation3 + $0x298] sm:$0xff]  ;;  %v198_v55 = vld [vmem:[#allocation3 + $0x308] sm:$0xff] }
  0x6f   :  { %734 = vmatmul.mubr.bf16.gmra.mxu0 %v220_v57  ;;  %v2980_v57 = vld [vmem:[#allocation5 + $0x100] sm:$0xff]   ;;  %v168_v6 = vld [vmem:[#allocation3 + $0x218] sm:$0xff] }
  0x70   :  { %831 = vmatmul.mubr.bf16.gmra.mxu1 %v222_v59  ;;  %741 = vmatprep.mubr.bf16.mxu0 %v228_v0  ;;  %v195_v59 = vld [vmem:[#allocation3 + $0x2f0] sm:$0xff]  ;;  %v185_v0 = vld [vmem:[#allocation3 + $0x2a0] sm:$0xff]  ;;  %v176_v7 = vld [vmem:[#allocation3 + $0x258] sm:$0xff] }
  0x71   :  { %838 = vmatprep.mubr.bf16.mxu1 %v230_v4  ;;  %2800 = vmatpush3.bf16.msra.mxu0 %v2970_v9  ;;  %v258_v63 = vpack.c.bf16 %v195_v59, %v188_v58  ;;  %v200_v4 = vld [vmem:[#allocation3 + $0x318] sm:$0xff]  ;;  %v255_v8 = vpack.c.bf16 %v192_v1, %v185_v0  ;;  %v257_v9 = vpack.c.bf16 %v194_v3, %v187_v2  ;;  %v205_v0 = vld [vmem:[#allocation3 + $0x340] sm:$0xff] }
  0x72   :  { %2801 = vmatprep.subr.bf16.mxu0 %v2971_v18  ;;  %v263_v10 = vpack.c.bf16 %v207_v5, %v200_v4  ;;  %v107_v18 = vld [vmem:[#allocation3 + $0x30] sm:$0xff]  ;;  %v254_v58 = vpack.c.bf16 %v184_v53, %v177_v52  ;;  %v212_v1 = vld [vmem:[#allocation3 + $0x378] sm:$0xff]  ;;  %v161_v5 = vld [vmem:[#allocation3 + $0x1e0] sm:$0xff] }
  0x73   :  { %v219_v23 = vpack.c.bf16 %v114_v19, %v107_v18  ;;  %v268_v4 = vpack.c.bf16 %v212_v1, %v205_v0  ;;  %v196_v18 = vld [vmem:[#allocation3 + $0x2f8] sm:$0xff] }
  0x74   :  { %v204_v19 = vld [vmem:[#allocation3 + $0x338] sm:$0xff] }
  0x75   :  { %2802 = vmatpush3.bf16.msra.mxu0 %v2972_v20  ;;  %v3010_v1 = vld [vmem:[#allocation10 + $0xc4] ss:$16 sps:$4 sm:$0xff]  }
  0x76   :  { %2803 = vmatprep.subr.bf16.mxu0 %v2973_v28  ;;  %v120_v28 = vld [vmem:[#allocation3 + $0x98] sm:$0xff] }
  0x77   :  { %742 = vmatmul.mubr.bf16.gmra.mxu0 %v227_v13  ;;  %v206_v13 = vld [vmem:[#allocation3 + $0x348] sm:$0xff] }
  0x78   :  { %839 = vmatmul.mubr.bf16.gmra.mxu1 %v229_v15  ;;  %749 = vmatprep.mubr.bf16.mxu0 %v235_v16  ;;  %v208_v15 = vld [vmem:[#allocation3 + $0x358] sm:$0xff]  ;;  %v106_v16 = vld [vmem:[#allocation3 + $0x28] sm:$0xff]  ;;  %v262_v20 = vpack.c.bf16 %v206_v13, %v199_v12 }
  0x79   :  { %846 = vmatprep.mubr.bf16.mxu1 %v237_v17  ;;  %2804 = vmatpush3.bf16.msra.mxu0 %v2974_v30  ;;  %v113_v17 = vld [vmem:[#allocation3 + $0x60] sm:$0xff]  ;;  %v264_v21 = vpack.c.bf16 %v208_v15, %v201_v14  ;;  %v135_v30 = vld [vmem:[#allocation3 + $0x110] sm:$0xff]  ;;  %v182_v12 = vld [vmem:[#allocation3 + $0x288] sm:$0xff] }
  0x7a   :  { %2805 = vmatprep.subr.bf16.mxu0 %v2975_v34  ;;  %v218_v22 = vpack.c.bf16 %v113_v17, %v106_v16  ;;  %v190_v13 = vld [vmem:[#allocation3 + $0x2c8] sm:$0xff]  ;;  %v197_v14 = vld [vmem:[#allocation3 + $0x300] sm:$0xff] }
  0x7b   :  { %v260_v16 = vpack.c.bf16 %v197_v14, %v190_v13  ;;  %v189_v17 = vld [vmem:[#allocation3 + $0x2c0] sm:$0xff]  ;;  %v3011_v13 = vld [vmem:[#allocation10 + $0xa0] ss:$16 sps:$4 sm:$0xff]  }
  0x7d   :  { %2806 = vmatpush3.bf16.msra.mxu0 %v2976_v35 }
  0x7e   :  { %2807 = vmatprep.subr.bf16.mxu0 %v2977_v45  ;;  %v232_v45 = vpack.c.bf16 %v141_v39, %v134_v38  ;;  %v3001_v38 = vld [vmem:[#allocation7 + $0x14] ss:$8 sps:$4 sm:$0xff]   ;;  %v2999_v39 = vld [vmem:[#allocation7 + $0x10] ss:$8 sps:$4 sm:$0xff]  }
  0x7f   :  { %750 = vmatmul.mubr.bf16.gmra.mxu0 %v234_v29  ;;  %v127_v29 = vld [vmem:[#allocation3 + $0xd0] sm:$0xff] }
  0x80   :  { %847 = vmatmul.mubr.bf16.gmra.mxu1 %v236_v31  ;;  %757 = vmatprep.mubr.bf16.mxu0 %v242_v32  ;;  %v142_v31 = vld [vmem:[#allocation3 + $0x148] sm:$0xff]  ;;  %v217_v32 = vpack.c.bf16 %v112_v25, %v105_v24  ;;  %v225_v34 = vpack.c.bf16 %v127_v29, %v120_v28  ;;  %v2983_v25 = vld [vmem:[#allocation7 + $0x74] ss:$8 sps:$4 sm:$0xff]  }
  0x81   :  { %854 = vmatprep.mubr.bf16.mxu1 %v244_v33  ;;  %2808 = vmatpush3.bf16.msra.mxu0 %v2978_v48  ;;  %v226_v33 = vpack.c.bf16 %v128_v27, %v121_v26  ;;  %v233_v35 = vpack.c.bf16 %v142_v31, %v135_v30  ;;  %v133_v48 = vld [vmem:[#allocation3 + $0x100] sm:$0xff]  ;;  %v210_v24 = vld [vmem:[#allocation3 + $0x368] sm:$0xff] }
  0x82   :  { %2809 = vmatprep.subr.bf16.mxu0 %v2979_v54  ;;  %v191_v54 = vld [vmem:[#allocation3 + $0x2d0] sm:$0xff]  ;;  %v2981_v26 = vld [vmem:[#allocation7 + $0x70] ss:$8 sps:$4 sm:$0xff]   ;;  %1229 = vmatprep.subr.bf16.mxu1 %v2983_v25  ;;  %v2989_v30 = vld [vmem:[#allocation7 + $0x54] ss:$8 sps:$4 sm:$0xff]  }
  0x83   :  { %v261_v59 = vpack.c.bf16 %v198_v55, %v191_v54  ;;  %v2986_v28 = vld [vmem:[#allocation7 + $0x64] ss:$8 sps:$4 sm:$0xff]   ;;  %v2984_v29 = vld [vmem:[#allocation7 + $0x60] ss:$8 sps:$4 sm:$0xff]   ;;  %v2987_v31 = vld [vmem:[#allocation7 + $0x50] ss:$8 sps:$4 sm:$0xff]  }
  0x84   :  { %v3019_v25 = vld [vmem:[#allocation10 + $0x64] ss:$16 sps:$4 sm:$0xff]  }
  0x85   :  { %2810 = vmatpush3.bf16.msra.mxu0 %v2980_v57  ;;  %v239_v57 = vpack.c.bf16 %v155_v51, %v148_v50 }
  0x87   :  { %758 = vmatmul.mubr.bf16.gmra.mxu0 %v241_v44  ;;  %v224_v44 = vpack.c.bf16 %v126_v37, %v119_v36  ;;  %v2998_v36 = vld [vmem:[#allocation7 + $0x24] ss:$8 sps:$4 sm:$0xff]   ;;  %v2996_v37 = vld [vmem:[#allocation7 + $0x20] ss:$8 sps:$4 sm:$0xff]  }
  0x88   :  { %855 = vmatmul.mubr.bf16.gmra.mxu1 %v243_v46  ;;  %765 = vmatprep.mubr.bf16.mxu0 %v249_v47  ;;  %v240_v46 = vpack.c.bf16 %v156_v41, %v149_v40  ;;  %v247_v47 = vpack.c.bf16 %v170_v43, %v163_v42  ;;  %v3004_v40 = vld [vmem:[#allocation7 + $0x4] ss:$8 sps:$4 sm:$0xff]   ;;  %v3002_v41 = vld [vmem:[#allocation7] ss:$8 sps:$4 sm:$0xff]   ;;  %v3284_v42 = vmov 0  }
  0x89   :  { %862 = vmatprep.mubr.bf16.mxu1 %v251_v49  ;;  %v140_v49 = vld [vmem:[#allocation3 + $0x138] sm:$0xff] }
  0x8a   :  { %v231_v56 = vpack.c.bf16 %v140_v49, %v133_v48 }
  0x8f   :  { %766 = vmatmul.mubr.bf16.gmra.mxu0 %v248_v60  ;;  %v147_v60 = vld [vmem:[#allocation3 + $0x170] sm:$0xff] }
  0x90   :  { %863 = vmatmul.mubr.bf16.gmra.mxu1 %v250_v61  ;;  %773 = vmatprep.mubr.bf16.mxu0 %v256_v62  ;;  %v154_v61 = vld [vmem:[#allocation3 + $0x1a8] sm:$0xff] }
  0x91   :  { %870 = vmatprep.mubr.bf16.mxu1 %v258_v63  ;;  %v162_v62 = vld [vmem:[#allocation3 + $0x1e8] sm:$0xff]  ;;  %v169_v63 = vld [vmem:[#allocation3 + $0x220] sm:$0xff]  ;;  %v238_v2 = vpack.c.bf16 %v154_v61, %v147_v60 }
  0x92   :  { %v246_v3 = vpack.c.bf16 %v169_v63, %v162_v62  ;;  %v3005_v61 = vld [vmem:[#allocation10 + $0xe0] ss:$16 sps:$4 sm:$0xff]   ;;  %v3007_v62 = vld [vmem:[#allocation10 + $0xe4] ss:$16 sps:$4 sm:$0xff]  }
  0x93   :  { %1828 = vmatprep.subr.bf16.mxu0 %v3007_v62 }
  0x97   :  { %774 = vmatmul.mubr.bf16.gmra.mxu0 %v255_v8  ;;  %v183_v8 = vld [vmem:[#allocation3 + $0x290] sm:$0xff] }
  0x98   :  { %871 = vmatmul.mubr.bf16.gmra.mxu1 %v257_v9  ;;  %781 = vmatprep.mubr.bf16.mxu0 %v263_v10  ;;  %v245_v9 = vpack.c.bf16 %v168_v6, %v161_v5  ;;  %v253_v10 = vpack.c.bf16 %v183_v8, %v176_v7  ;;  %v3008_v5 = vld [vmem:[#allocation10 + $0xc0] ss:$16 sps:$4 sm:$0xff]   ;;  %v3385_v6 = vld [vmem:[#allocation10 + $0xec] ss:$16 sps:$4 sm:$0xff]  }
  0x99   :  { %878 = vmatprep.mubr.bf16.mxu1 %v265_v11  ;;  %v175_v11 = vld [vmem:[#allocation3 + $0x250] sm:$0xff] }
  0x9a   :  { %v252_v15 = vpack.c.bf16 %v182_v12, %v175_v11 }
  0x9f   :  { %782 = vmatmul.mubr.bf16.gmra.mxu0 %v262_v20  ;;  %v211_v20 = vld [vmem:[#allocation3 + $0x370] sm:$0xff] }
  0xa0   :  { %879 = vmatmul.mubr.bf16.gmra.mxu1 %v264_v21  ;;  %919 = vmatprep.mubr.bf16.mxu0 %v218_v22  ;;  %v259_v21 = vpack.c.bf16 %v196_v18, %v189_v17  ;;  %v267_v22 = vpack.c.bf16 %v211_v20, %v204_v19 }
  0xa1   :  { %2870 = vmatprep.mubr.msk.bf16.mxu1 %vm668_vm0, %v219_v23  ;;  %v203_v23 = vld [vmem:[#allocation3 + $0x330] sm:$0xff] }
  0xa2   :  { %v266_v27 = vpack.c.bf16 %v210_v24, %v203_v23 }
  0xa7   :  { %920 = vmatmul.mubr.bf16.vlgmr.msra.gmra.mxu0 %v217_v32  ;;  %v2992_v32 = vld [vmem:[#allocation7 + $0x44] ss:$8 sps:$4 sm:$0xff]  }
  0xa8   :  { %2871 = vmatmul.mubr.msk.bf16.vlgmr.msra.gmra.mxu1 %vm668_vm0, %v226_v33  ;;  %927 = vmatprep.mubr.bf16.mxu0 %v225_v34  ;;  %v2990_v33 = vld [vmem:[#allocation7 + $0x40] ss:$8 sps:$4 sm:$0xff]   ;;  %v2995_v34 = vld [vmem:[#allocation7 + $0x34] ss:$8 sps:$4 sm:$0xff]  }
  0xa9   :  { %2874 = vmatprep.mubr.msk.bf16.mxu1 %vm668_vm0, %v233_v35  ;;  %1230 = vmatpush1.bf16.msra.mxu1 %v2981_v26  ;;  %v2993_v35 = vld [vmem:[#allocation7 + $0x30] ss:$8 sps:$4 sm:$0xff]  }
  0xaa   :  { %1231 = vmatprep.subr.bf16.mxu1 %v2986_v28  ;;  %1829 = vmatpush1.bf16.msra.mxu0 %v3005_v61  ;;  %v3035_v61 = vld [vmem:[#allocation10] ss:$16 sps:$4 sm:$0xff]  }
  0xab   :  { %1830 = vmatprep.subr.bf16.mxu0 %v3010_v1  ;;  %v3043_v1 = vld [vmem:[#allocation10 + $0x1e4] ss:$16 sps:$4 sm:$0xff]  }
  0xad   :  { %1232 = vmatpush1.bf16.msra.mxu1 %v2984_v29  ;;  %v3017_v29 = vld [vmem:[#allocation10 + $0x60] ss:$16 sps:$4 sm:$0xff]  }
  0xae   :  { %1233 = vmatprep.subr.bf16.mxu1 %v2989_v30  ;;  %1831 = vmatpush1.bf16.msra.mxu0 %v3008_v5 }
  0xaf   :  { %928 = vmatmul.mubr.bf16.gmra.mxu0 %v224_v44 }
  0xb0   :  { %935 = vmatprep.mubr.bf16.mxu0 %v232_v45  ;;  %2875 = vmatmul.mubr.msk.bf16.gmra.mxu1 %vm668_vm0, %v240_v46  ;;  %v3365_v45 = vld [vmem:[%s4040_s2] ss:$0 sm:$0xff] }
  0xb1   :  { %2878 = vmatprep.mubr.msk.bf16.mxu1 %vm668_vm0, %v247_v47  ;;  %1234 = vmatpush1.bf16.msra.mxu1 %v2987_v31 }
  0xb2   :  { %1235 = vmatprep.subr.bf16.mxu1 %v2992_v32  ;;  %v3025_v32 = vld [vmem:[#allocation10 + $0x44] ss:$16 sps:$4 sm:$0xff]  }
  0xb5   :  { %1236 = vmatpush1.bf16.msra.mxu1 %v2990_v33 }
  0xb6   :  { %1237 = vmatprep.subr.bf16.mxu1 %v2995_v34 }
  0xb7   :  { %936 = vmatmul.mubr.bf16.gmra.mxu0 %v231_v56 }
  0xb8   :  { %943 = vmatprep.mubr.bf16.mxu0 %v239_v57  ;;  %2879 = vmatmul.mubr.msk.bf16.gmra.mxu1 %vm668_vm0, %v254_v58 }
  0xb9   :  { %2882 = vmatprep.mubr.msk.bf16.mxu1 %vm668_vm0, %v261_v59  ;;  %1238 = vmatpush1.bf16.msra.mxu1 %v2993_v35 }
  0xba   :  { %1239 = vmatprep.subr.bf16.mxu1 %v2998_v36 }
  0xbd   :  { %1240 = vmatpush1.bf16.msra.mxu1 %v2996_v37 }
  0xbe   :  { %1241 = vmatprep.subr.bf16.mxu1 %v3001_v38  ;;  %v3023_v38 = vld [vmem:[#allocation10 + $0x40] ss:$16 sps:$4 sm:$0xff]  }
  0xbf   :  { %944 = vmatmul.mubr.bf16.gmra.mxu0 %v238_v2 }
  0xc0   :  { %951 = vmatprep.mubr.bf16.mxu0 %v246_v3  ;;  %2883 = vmatmul.mubr.msk.bf16.gmra.mxu1 %vm668_vm0, %v268_v4 }
  0xc1   :  { %1242 = vmatpush1.bf16.msra.mxu1 %v2999_v39  ;;  %1261 = vmatprep.mubr.bf16.mxu1 %v3284_v42 }
  0xc2   :  { %1243 = vmatprep.subr.bf16.mxu1 %v3004_v40 }
  0xc5   :  { %1244 = vmatpush1.bf16.msra.mxu1 %v3002_v41  ;;  %v3031_v41 = vld [vmem:[#allocation10 + $0x24] ss:$16 sps:$4 sm:$0xff]  }
  0xc6   :  { %2886 = vmatprep.subr.bf16.mxu1 %v3385_v6 }
  0xc7   :  { %952 = vmatmul.mubr.bf16.gmra.mxu0 %v245_v9  ;;  %v3013_v9 = vld [vmem:[#allocation10 + $0xa4] ss:$16 sps:$4 sm:$0xff]  }
  0xc8   :  { %959 = vmatprep.mubr.bf16.mxu0 %v253_v10  ;;  %1832 = vmatprep.subr.bf16.mxu0 %v3013_v9 }
  0xc9   :  { %1833 = vmatpush1.bf16.msra.mxu0 %v3011_v13  ;;  %v3049_v13 = vld [vmem:[#allocation10 + $0x1c4] ss:$16 sps:$4 sm:$0xff]  }
  0xcf   :  { %960 = vmatmul.mubr.bf16.gmra.mxu0 %v252_v15 }
  0xd0   :  { %967 = vmatprep.mubr.bf16.mxu0 %v260_v16  ;;  %v3016_v16 = vld [vmem:[#allocation10 + $0x84] ss:$16 sps:$4 sm:$0xff]  }
  0xd1   :  { %1834 = vmatprep.subr.bf16.mxu0 %v3016_v16 }
  0xd7   :  { %968 = vmatmul.mubr.bf16.gmra.mxu0 %v259_v21 }
  0xd8   :  { %975 = vmatprep.mubr.bf16.mxu0 %v267_v22  ;;  %v3014_v22 = vld [vmem:[#allocation10 + $0x80] ss:$16 sps:$4 sm:$0xff]  }
  0xd9   :  { %1835 = vmatpush1.bf16.msra.mxu0 %v3014_v22  ;;  %v3047_v22 = vld [vmem:[#allocation10 + $0x1c0] ss:$16 sps:$4 sm:$0xff]  }
  0xda   :  { %1836 = vmatprep.subr.bf16.mxu0 %v3019_v25 }
  0xdd   :  { %1837 = vmatpush1.bf16.msra.mxu0 %v3017_v29 }
  0xde   :  { %1838 = vmatprep.subr.bf16.mxu0 %v3025_v32 }
  0xdf   :  { %976 = vmatmul.mubr.bf16.gmra.mxu0 %v266_v27 }
  0xe1   :  { %1839 = vmatpush1.bf16.msra.mxu0 %v3023_v38 }
  0xe2   :  { %1840 = vmatprep.subr.bf16.mxu0 %v3031_v41 }
 0x127   :  { %v2683_v43 = vpop.f32.mrf.mxu0 }
 0x128   :  { %v2747_v44 = vpop.f32.mrf.mxu1 }
 0x129   :  { %v2684_v46 = vpop.f32.mrf.mxu0 }
 0x12a   :  { %v2685_v47 = vadd.f32 %v2684_v46, %v2683_v43  ;;  %v2748_v48 = vpop.f32.mrf.mxu1 }
 0x12b   :  { %v2749_v49 = vadd.f32 %v2748_v48, %v2747_v44  ;;  %v3367_v50 = vpop.f32.mrf.mxu0 }
 0x12c   :  { %v728_v51 = vadd.f32 %v2685_v47, %v3365_v45  ;;  %v3370_v52 = vpop.f32.mrf.mxu1  ;;  %v3029_v47 = vld [vmem:[#allocation10 + $0x20] ss:$16 sps:$4 sm:$0xff]  }
 0x12d   :  { %v3372_v53 = vpop.f32.mrf.mxu0  ;;  %1841 = vmatpush1.bf16.msra.mxu0 %v3029_v47  ;;  %v3059_v47 = vld [vmem:[#allocation10 + $0x180] ss:$16 sps:$4 sm:$0xff]  }
 0x12e   :  { %v3374_v54 = vadd.f32 %v2749_v49, %v728_v51  ;;  %v3376_v55 = vpop.f32.mrf.mxu1  ;;  %v3037_v51 = vld [vmem:[#allocation10 + $0x4] ss:$16 sps:$4 sm:$0xff]  }
 0x12f   :  { %v2689_v56 = vpop.f32.mrf.mxu0  ;;  %1842 = vmatprep.subr.bf16.mxu0 %v3037_v51 }
 0x130   :  { %v2753_v57 = vpop.f32.mrf.mxu1 }
 0x131   :  { %v2690_v58 = vpop.f32.mrf.mxu0  ;;  %1843 = vmatpush1.bf16.msra.mxu0 %v3035_v61 }
 0x132   :  { %v2691_v59 = vadd.f32 %v2690_v58, %v2689_v56  ;;  %v2754_v60 = vpop.f32.mrf.mxu1  ;;  %1844 = vmatprep.subr.bf16.mxu0 %v3043_v1 }
 0x133   :  { %v2755_v63 = vadd.f32 %v2754_v60, %v2753_v57  ;;  %v3378_v0 = vpop.f32.mrf.mxu0 }
 0x134   :  { %v736_v2 = vadd.f32 %v2691_v59, %v3365_v45  ;;  %v3381_v3 = vpop.f32.mrf.mxu1 }
 0x135   :  { %v3383_v4 = vpop.f32.mrf.mxu0 }
 0x136   :  { %v3387_v7 = vadd.f32 %v2755_v63, %v736_v2  ;;  %v3389_v8 = vpop.f32.mrf.mxu1 }
 0x137   :  { %v2695_v10 = vpop.f32.mrf.mxu0 }
 0x138   :  { %v2759_v11 = vpop.f32.mrf.mxu1 }
 0x139   :  { %v2696_v12 = vpop.f32.mrf.mxu0 }
 0x13a   :  { %v2697_v14 = vadd.f32 %v2696_v12, %v2695_v10  ;;  %v2760_v15 = vpop.f32.mrf.mxu1  ;;  %v3041_v10 = vld [vmem:[#allocation10 + $0x1e0] ss:$16 sps:$4 sm:$0xff]  }
 0x13b   :  { %v2761_v17 = vadd.f32 %v2760_v15, %v2759_v11  ;;  %v3392_v18 = vpop.f32.mrf.mxu0  ;;  %1845 = vmatpush2.bf16.msra.mxu0 %v3041_v10 }
 0x13c   :  { %v744_v19 = vadd.f32 %v2697_v14, %v3365_v45  ;;  %v3395_v20 = vpop.f32.mrf.mxu1  ;;  %1846 = vmatprep.subr.bf16.mxu0 %v3049_v13 }
 0x13d   :  { %v3397_v21 = vpop.f32.mrf.mxu0 }
 0x13e   :  { %v3399_v23 = vadd.f32 %v2761_v17, %v744_v19  ;;  %v3401_v24 = vpop.f32.mrf.mxu1 }
 0x13f   :  { %v2701_v26 = vpop.f32.mrf.mxu0  ;;  %1847 = vmatpush2.bf16.msra.mxu0 %v3047_v22 }
 0x140   :  { %v2765_v27 = vpop.f32.mrf.mxu1 }
 0x141   :  { %v2702_v28 = vpop.f32.mrf.mxu0 }
 0x142   :  { %v2703_v30 = vadd.f32 %v2702_v28, %v2701_v26  ;;  %v2766_v31 = vpop.f32.mrf.mxu1 }
 0x143   :  { %v2767_v33 = vadd.f32 %v2766_v31, %v2765_v27  ;;  %v3403_v34 = vpop.f32.mrf.mxu0  ;;  %v3055_v27 = vld [vmem:[#allocation10 + $0x1a4] ss:$16 sps:$4 sm:$0xff]   ;;  %v3053_v31 = vld [vmem:[#allocation10 + $0x1a0] ss:$16 sps:$4 sm:$0xff]  }
 0x144   :  { %v752_v35 = vadd.f32 %v2703_v30, %v3365_v45  ;;  %v3406_v36 = vpop.f32.mrf.mxu1  ;;  %1848 = vmatprep.subr.bf16.mxu0 %v3055_v27 }
 0x145   :  { %v3408_v37 = vpop.f32.mrf.mxu0  ;;  %1849 = vmatpush2.bf16.msra.mxu0 %v3053_v31 }
 0x146   :  { %v3410_v39 = vadd.f32 %v2767_v33, %v752_v35  ;;  %v3412_v40 = vpop.f32.mrf.mxu1  ;;  %v3061_v35 = vld [vmem:[#allocation10 + $0x184] ss:$16 sps:$4 sm:$0xff]  }
 0x147   :  { %v2707_v43 = vpop.f32.mrf.mxu0  ;;  %1850 = vmatprep.subr.bf16.mxu0 %v3061_v35 }
 0x148   :  { %v2771_v44 = vpop.f32.mrf.mxu1 }
 0x149   :  { %v2708_v46 = vpop.f32.mrf.mxu0  ;;  %1851 = vmatpush2.bf16.msra.mxu0 %v3059_v47 }
 0x14a   :  { %v2709_v48 = vadd.f32 %v2708_v46, %v2707_v43  ;;  %v2772_v49 = vpop.f32.mrf.mxu1 }
 0x14b   :  { %v2773_v56 = vadd.f32 %v2772_v49, %v2771_v44  ;;  %v3414_v57 = vpop.f32.mrf.mxu0 }
 0x14c   :  { %v760_v58 = vadd.f32 %v2709_v48, %v3365_v45  ;;  %v3417_v59 = vpop.f32.mrf.mxu1 }
 0x14d   :  { %v3419_v60 = vpop.f32.mrf.mxu0 }
 0x14e   :  { %v3421_v62 = vadd.f32 %v2773_v56, %v760_v58  ;;  %v3423_v63 = vpop.f32.mrf.mxu1 }
 0x14f   :  { %v2713_v2 = vpop.f32.mrf.mxu0 }
 0x150   :  { %v2777_v5 = vpop.f32.mrf.mxu1 }
 0x151   :  { %v2714_v9 = vpop.f32.mrf.mxu0 }
 0x152   :  { %v2715_v11 = vadd.f32 %v2714_v9, %v2713_v2  ;;  %v2778_v12 = vpop.f32.mrf.mxu1 }
 0x153   :  { %v2779_v14 = vadd.f32 %v2778_v12, %v2777_v5  ;;  %v3425_v15 = vpop.f32.mrf.mxu0  ;;  %v2688_v12 = vadd.f32 %v3372_v53, %v3367_v50  ;;  %v2694_v50 = vadd.f32 %v3383_v4, %v3378_v0 }
 0x154   :  { %v768_v16 = vadd.f32 %v2715_v11, %v3365_v45  ;;  %v3428_v17 = vpop.f32.mrf.mxu1 }
 0x155   :  { %v3430_v19 = vpop.f32.mrf.mxu0 }
 0x156   :  { %v3432_v25 = vadd.f32 %v2779_v14, %v768_v16  ;;  %v3434_v26 = vpop.f32.mrf.mxu1 }
 0x157   :  { %v2719_v28 = vpop.f32.mrf.mxu0 }
 0x158   :  { %v2783_v29 = vpop.f32.mrf.mxu1 }
 0x159   :  { %v2720_v30 = vpop.f32.mrf.mxu0 }
 0x15a   :  { %v2721_v32 = vadd.f32 %v2720_v30, %v2719_v28  ;;  %v2784_v33 = vpop.f32.mrf.mxu1  ;;  %v731_v28 = vadd.f32 %v2688_v12, %v3365_v45 }
 0x15b   :  { %v2785_v38 = vadd.f32 %v2784_v33, %v2783_v29  ;;  %v3436_v41 = vpop.f32.mrf.mxu0 }
 0x15c   :  { %v776_v43 = vadd.f32 %v2721_v32, %v3365_v45  ;;  %v3439_v44 = vpop.f32.mrf.mxu1  ;;  %v2752_v32 = vadd.f32 %v3376_v55, %v3370_v52  ;;  %v2758_v52 = vadd.f32 %v3389_v8, %v3381_v3  ;;  %v3474_v3 = vld [vmem:[#allocation10 + $0xcc] ss:$16 sps:$4 sm:$0xff]  }
 0x15d   :  { %v3441_v46 = vpop.f32.mrf.mxu0 }
 0x15e   :  { %v3443_v48 = vadd.f32 %v2785_v38, %v776_v43  ;;  %v3445_v49 = vpop.f32.mrf.mxu1  ;;  %v828_v38 = vadd.f32 %v2752_v32, %v731_v28 }
 0x15f   :  { %v2725_v51 = vpop.f32.mrf.mxu0 }
 0x160   :  { %v2789_v56 = vpop.f32.mrf.mxu1 }
 0x161   :  { %v2726_v58 = vpop.f32.mrf.mxu0 }
 0x162   :  { %v2727_v61 = vadd.f32 %v2726_v58, %v2725_v51  ;;  %v2790_v1 = vpop.f32.mrf.mxu1  ;;  %v739_v58 = vadd.f32 %v2694_v50, %v3365_v45  ;;  %v3472_v50 = vld [vmem:[#allocation10 + $0xe8] ss:$16 sps:$4 sm:$0xff]  }
 0x163   :  { %v2791_v2 = vadd.f32 %v2790_v1, %v2789_v56  ;;  %v3447_v5 = vpop.f32.mrf.mxu0 }
 0x164   :  { %v784_v9 = vadd.f32 %v2727_v61, %v3365_v45  ;;  %v3450_v10 = vpop.f32.mrf.mxu1  ;;  %v836_v4 = vadd.f32 %v2758_v52, %v739_v58 }
 0x165   :  { %v3452_v11 = vpop.f32.mrf.mxu0 }
 0x166   :  { %v3456_v13 = vadd.f32 %v2791_v2, %v784_v9  ;;  %v3458_v14 = vpop.f32.mrf.mxu1 }
 0x167   :  { %v2811_v16 = vpop.f32.mrf.mxu0 }
 0x168   :  { %v2872_v22 = vpop.f32.mrf.mxu1 }
 0x169   :  { %v2812_v27 = vpop.f32.mrf.mxu0 }
 0x16a   :  { %v2813_v29 = vadd.f32 %v2812_v27, %v2811_v16  ;;  %v1018_v30 = vpop.f32.mrf.mxu1  ;;  %v2700_v16 = vadd.f32 %v3397_v21, %v3392_v18  ;;  %v2764_v21 = vadd.f32 %v3401_v24, %v3395_v20 }
 0x16b   :  { %v2814_v31 = vpop.f32.mrf.mxu0 }
 0x16c   :  { %v922_v33 = vadd.f32 %v2813_v29, %v3374_v54  ;;  %v2873_v53 = vpop.f32.mrf.mxu1  ;;  %v747_v8 = vadd.f32 %v2700_v16, %v3365_v45  ;;  %v3493_v16 = vld [vmem:[#allocation10 + $0x8c] ss:$16 sps:$4 sm:$0xff]  }
 0x16d   :  { %v2815_v35 = vpop.f32.mrf.mxu0 }
 0x16e   :  { %v1019_v43 = vadd.f32 %v1018_v30, %v922_v33  ;;  %v2816_v47 = vadd.f32 %v2815_v35, %v2814_v31  ;;  %v1021_v61 = vpop.f32.mrf.mxu1 }
 0x16f   :  { %v2817_v51 = vpop.f32.mrf.mxu0 }
 0x170   :  { %v925_v56 = vadd.f32 %v2816_v47, %v828_v38  ;;  %v1081_v2 = vmul.f32 0.2, %v1019_v43  ;;  %v2876_v28 = vpop.f32.mrf.mxu1 }
 0x171   :  { %v2818_v1 = vpop.f32.mrf.mxu0 }
 0x172   :  { %v1022_v9 = vadd.f32 %v1021_v61, %v925_v56  ;;  %v2819_v12 = vadd.f32 %v2818_v1, %v2817_v51  ;;  %v1097_v29 = vmax.f32 %v1019_v43, %v1081_v2  ;;  %v3481_v43 = vld [vmem:[#allocation10 + $0xc8] ss:$16 sps:$4 sm:$0xff]   ;;  %v3485_v1 = vld [vmem:[#allocation10 + $0xac] ss:$16 sps:$4 sm:$0xff]   ;;  %v2706_v2 = vadd.f32 %v3408_v37, %v3403_v34 }
 0x173   :  { %v2820_v54 = vpop.f32.mrf.mxu0 }
 0x174   :  { %v1082_v55 = vmul.f32 0.2, %v1022_v9  ;;  %v930_v0 = vadd.f32 %v2819_v12, %v3387_v7  ;;  %v1034_v7 = vpop.f32.mrf.mxu1 }
 0x175   :  { %v2821_v27 = vpop.f32.mrf.mxu0 }
 0x176   :  { %v1098_v30 = vmax.f32 %v1022_v9, %v1082_v55  ;;  %v1027_v31 = vadd.f32 %v2872_v22, %v930_v0  ;;  %v2822_v32 = vadd.f32 %v2821_v27, %v2820_v54  ;;  %v2877_v9 = vpop.f32.mrf.mxu1  ;;  %v3490_v0 = vld [vmem:[#allocation10 + $0xa8] ss:$16 sps:$4 sm:$0xff]   ;;  %v755_v27 = vadd.f32 %v2706_v2, %v3365_v45  ;;  %v3512_v2 = vld [vmem:[#allocation10 + $0x4c] ss:$16 sps:$4 sm:$0xff]  }
 0x177   :  { %v2823_v33 = vpop.f32.mrf.mxu0 }
 0x178   :  { %v1113_v35 = vpack.c.bf16 %v1098_v30, %v1097_v29  ;;  %v933_v38 = vadd.f32 %v2822_v32, %v836_v4  ;;  %v1083_v51 = vmul.f32 0.2, %v1027_v31  ;;  %v1037_v34 = vpop.f32.mrf.mxu1 }
 0x179   :  { %v2824_v47 = vpop.f32.mrf.mxu0 }
 0x17a   :  { %v1030_v56 = vadd.f32 %v2873_v53, %v933_v38  ;;  %v2825_v18 = vadd.f32 %v2824_v47, %v2823_v33  ;;  %1262 = vmatmul.mubr.bf16.vlgmr.msra.gmra.mxu1 %v1113_v35  ;;  %v844_v53 = vadd.f32 %v2764_v21, %v747_v8  ;;  %v1099_v52 = vmax.f32 %v1027_v31, %v1083_v51  ;;  %v3500_v35 = vld [vmem:[#allocation10 + $0x88] ss:$16 sps:$4 sm:$0xff]  }
 0x17b   :  { %v2826_v22 = vpop.f32.mrf.mxu0  ;;  %1271 = vmatprep.mubr.bf16.mxu1 %v3284_v42  ;;  %2902 = vmatpush1.bf16.msra.mxu1 %v3472_v50  ;;  %v2770_v31 = vadd.f32 %v3412_v40, %v3406_v36  ;;  %v2712_v51 = vadd.f32 %v3419_v60, %v3414_v57  ;;  %v2880_v36 = vpop.f32.mrf.mxu1 }
 0x17c   :  { %v1084_v58 = vmul.f32 0.2, %v1030_v56  ;;  %v938_v61 = vadd.f32 %v2825_v18, %v3399_v23  ;;  %2887 = vmatprep.subr.bf16.mxu1 %v3474_v3 }
 0x17d   :  { %v2827_v20 = vpop.f32.mrf.mxu0  ;;  %v852_v47 = vadd.f32 %v2770_v31, %v755_v27  ;;  %v1050_v57 = vpop.f32.mrf.mxu1  ;;  %v3523_v27 = vld [vmem:[#allocation10 + $0x2c] ss:$16 sps:$4 sm:$0xff]  }
 0x17e   :  { %v1035_v24 = vadd.f32 %v1034_v7, %v938_v61  ;;  %v2828_v12 = vadd.f32 %v2827_v20, %v2826_v22  ;;  %v1100_v54 = vmax.f32 %v1030_v56, %v1084_v58  ;;  %v3504_v7 = vld [vmem:[#allocation10 + $0x6c] ss:$16 sps:$4 sm:$0xff]   ;;  %v3509_v61 = vld [vmem:[#allocation10 + $0x68] ss:$16 sps:$4 sm:$0xff]   ;;  %v763_v20 = vadd.f32 %v2712_v51, %v3365_v45 }
 0x17f   :  { %v2829_v55 = vpop.f32.mrf.mxu0  ;;  %2903 = vmatpush1.bf16.msra.mxu1 %v3481_v43 }
 0x180   :  { %v941_v23 = vadd.f32 %v2828_v12, %v844_v53  ;;  %v1114_v4 = vpack.c.bf16 %v1100_v54, %v1099_v52  ;;  %2888 = vmatprep.subr.bf16.mxu1 %v3485_v1  ;;  %v1085_v29 = vmul.f32 0.2, %v1035_v24 }
 0x181   :  { %v2830_v37 = vpop.f32.mrf.mxu0 }
 0x182   :  { %v1038_v30 = vadd.f32 %v1037_v34, %v941_v23  ;;  %v2831_v32 = vadd.f32 %v2830_v37, %v2829_v55  ;;  %1272 = vmatmul.mubr.bf16.gmra.mxu1 %v1114_v4  ;;  %v1101_v21 = vmax.f32 %v1035_v24, %v1085_v29  ;;  %v2776_v24 = vadd.f32 %v3423_v63, %v3417_v59  ;;  %v3519_v55 = vld [vmem:[#allocation10 + $0x48] ss:$16 sps:$4 sm:$0xff]   ;;  %v2881_v37 = vpop.f32.mrf.mxu1 }
 0x183   :  { %v2832_v33 = vpop.f32.mrf.mxu0  ;;  %1281 = vmatprep.mubr.bf16.mxu1 %v3284_v42  ;;  %2904 = vmatpush1.bf16.msra.mxu1 %v3490_v0  ;;  %v2718_v34 = vadd.f32 %v3430_v19, %v3425_v15 }
 0x184   :  { %v1086_v38 = vmul.f32 0.2, %v1038_v30  ;;  %v946_v8 = vadd.f32 %v2831_v32, %v3410_v39  ;;  %2889 = vmatprep.subr.bf16.mxu1 %v3493_v16  ;;  %v1053_v15 = vpop.f32.mrf.mxu1 }
 0x185   :  { %v2833_v56 = vpop.f32.mrf.mxu0 }
 0x186   :  { %v1043_v40 = vadd.f32 %v2876_v28, %v946_v8  ;;  %v2834_v18 = vadd.f32 %v2833_v56, %v2832_v33  ;;  %v1102_v22 = vmax.f32 %v1038_v30, %v1086_v38  ;;  %v3528_v33 = vld [vmem:[#allocation10 + $0x28] ss:$16 sps:$4 sm:$0xff]   ;;  %v3531_v8 = vld [vmem:[#allocation10 + $0xc] ss:$16 sps:$4 sm:$0xff]  }
 0x187   :  { %v2835_v58 = vpop.f32.mrf.mxu0  ;;  %2905 = vmatpush1.bf16.msra.mxu1 %v3500_v35 }
 0x188   :  { %v949_v39 = vadd.f32 %v2834_v18, %v852_v47  ;;  %v1115_v53 = vpack.c.bf16 %v1102_v22, %v1101_v21  ;;  %2890 = vmatprep.subr.bf16.mxu1 %v3504_v7  ;;  %v1087_v12 = vmul.f32 0.2, %v1043_v40  ;;  %v771_v47 = vadd.f32 %v2718_v34, %v3365_v45  ;;  %v3538_v22 = vld [vmem:[#allocation10 + $0x8] ss:$16 sps:$4 sm:$0xff]  }
 0x189   :  { %v2836_v60 = vpop.f32.mrf.mxu0 }
 0x18a   :  { %v1046_v28 = vadd.f32 %v2877_v9, %v949_v39  ;;  %v2837_v52 = vadd.f32 %v2836_v60, %v2835_v58  ;;  %1282 = vmatmul.mubr.bf16.gmra.mxu1 %v1115_v53  ;;  %v860_v9 = vadd.f32 %v2776_v24, %v763_v20  ;;  %v1103_v30 = vmax.f32 %v1043_v40, %v1087_v12  ;;  %v2884_v60 = vpop.f32.mrf.mxu1 }
 0x18b   :  { %v2838_v54 = vpop.f32.mrf.mxu0  ;;  %1291 = vmatprep.mubr.bf16.mxu1 %v3284_v42  ;;  %2906 = vmatpush1.bf16.msra.mxu1 %v3509_v61  ;;  %v2782_v40 = vadd.f32 %v3434_v26, %v3428_v17  ;;  %v2724_v20 = vadd.f32 %v3441_v46, %v3436_v41  ;;  %v2788_v41 = vadd.f32 %v3445_v49, %v3439_v44 }
 0x18c   :  { %v1088_v23 = vmul.f32 0.2, %v1046_v28  ;;  %v954_v4 = vadd.f32 %v2837_v52, %v3421_v62  ;;  %2891 = vmatprep.subr.bf16.mxu1 %v3512_v2 }
 0x18d   :  { %v2839_v59 = vpop.f32.mrf.mxu0  ;;  %v868_v53 = vadd.f32 %v2782_v40, %v771_v47 }
 0x18e   :  { %v1051_v63 = vadd.f32 %v1050_v57, %v954_v4  ;;  %v2840_v29 = vadd.f32 %v2839_v59, %v2838_v54  ;;  %v1104_v32 = vmax.f32 %v1046_v28, %v1088_v23  ;;  %v779_v23 = vadd.f32 %v2724_v20, %v3365_v45 }
 0x18f   :  { %v2841_v31 = vpop.f32.mrf.mxu0  ;;  %2907 = vmatpush1.bf16.msra.mxu1 %v3519_v55 }
 0x190   :  { %v957_v62 = vadd.f32 %v2840_v29, %v860_v9  ;;  %v1116_v38 = vpack.c.bf16 %v1104_v32, %v1103_v30  ;;  %2892 = vmatprep.subr.bf16.mxu1 %v3523_v27  ;;  %v1089_v51 = vmul.f32 0.2, %v1051_v63  ;;  %v876_v29 = vadd.f32 %v2788_v41, %v779_v23  ;;  %v3067_v23 = vld [vmem:[#allocation10 + $0x164] ss:$16 sps:$4 sm:$0xff]   ;;  %v3570_v41 = vld [vmem:[#allocation10 + $0x1ac] ss:$16 sps:$4 sm:$0xff]  }
 0x191   :  { %v2842_v19 = vpop.f32.mrf.mxu0  ;;  %v2730_v30 = vadd.f32 %v3452_v11, %v3447_v5  ;;  %v2794_v5 = vadd.f32 %v3458_v14, %v3450_v10  ;;  %1852 = vmatprep.subr.bf16.mxu0 %v3067_v23 }
 0x192   :  { %v1054_v56 = vadd.f32 %v1053_v15, %v957_v62  ;;  %v2843_v18 = vadd.f32 %v2842_v19, %v2841_v31  ;;  %1292 = vmatmul.mubr.bf16.gmra.mxu1 %v1116_v38  ;;  %v1105_v26 = vmax.f32 %v1051_v63, %v1089_v51 }
 0x193   :  { %v2844_v21 = vpop.f32.mrf.mxu0  ;;  %1301 = vmatprep.mubr.bf16.mxu1 %v3284_v42  ;;  %2908 = vmatpush1.bf16.msra.mxu1 %v3528_v33  ;;  %v787_v44 = vadd.f32 %v2730_v30, %v3365_v45  ;;  %v3083_v30 = vld [vmem:[#allocation10 + $0x100] ss:$16 sps:$4 sm:$0xff]  }
 0x194   :  { %v1090_v58 = vmul.f32 0.2, %v1054_v56  ;;  %v962_v39 = vadd.f32 %v2843_v18, %v3432_v25  ;;  %2893 = vmatprep.subr.bf16.mxu1 %v3531_v8  ;;  %v1066_v25 = vpop.f32.mrf.mxu1 }
 0x195   :  { %v2845_v57 = vpop.f32.mrf.mxu0 }
 0x196   :  { %v1059_v12 = vadd.f32 %v2880_v36, %v962_v39  ;;  %v2846_v17 = vadd.f32 %v2845_v57, %v2844_v21  ;;  %v1106_v28 = vmax.f32 %v1054_v56, %v1090_v58  ;;  %v2885_v32 = vpop.f32.mrf.mxu1  ;;  %v884_v39 = vadd.f32 %v2794_v5, %v787_v44 }
 0x197   :  { %v2847_v52 = vpop.f32.mrf.mxu0  ;;  %2909 = vmatpush1.bf16.msra.mxu1 %v3538_v22 }
 0x198   :  { %v965_v24 = vadd.f32 %v2846_v17, %v868_v53  ;;  %v1117_v54 = vpack.c.bf16 %v1106_v28, %v1105_v26  ;;  %v1091_v9 = vmul.f32 0.2, %v1059_v12  ;;  %v1069_v49 = vpop.f32.mrf.mxu1 }
 0x199   :  { %v2848_v4 = vpop.f32.mrf.mxu0 }
 0x19a   :  { %v1062_v34 = vadd.f32 %v2881_v37, %v965_v24  ;;  %v2849_v59 = vadd.f32 %v2848_v4, %v2847_v52  ;;  %1302 = vmatmul.mubr.bf16.gmra.mxu1 %v1117_v54  ;;  %v1107_v37 = vmax.f32 %v1059_v12, %v1091_v9  ;;  %v3073_v4 = vld [vmem:[#allocation10 + $0x144] ss:$16 sps:$4 sm:$0xff]   ;;  %v3564_v9 = vld [vmem:[#allocation10 + $0x1cc] ss:$16 sps:$4 sm:$0xff]  }
 0x19b   :  { %v2850_v46 = vpop.f32.mrf.mxu0  ;;  %1311 = vmatprep.mubr.bf16.mxu1 %v3284_v42 }
 0x19c   :  { %v1092_v36 = vmul.f32 0.2, %v1062_v34  ;;  %v970_v63 = vadd.f32 %v2849_v59, %v3443_v48  ;;  %v3079_v59 = vld [vmem:[#allocation10 + $0x124] ss:$16 sps:$4 sm:$0xff]  }
 0x19d   :  { %v2851_v31 = vpop.f32.mrf.mxu0 }
 0x19e   :  { %v1067_v62 = vadd.f32 %v1066_v25, %v970_v63  ;;  %v2852_v38 = vadd.f32 %v2851_v31, %v2850_v46  ;;  %v1108_v47 = vmax.f32 %v1062_v34, %v1092_v36  ;;  %v3065_v25 = vld [vmem:[#allocation10 + $0x160] ss:$16 sps:$4 sm:$0xff]   ;;  %v3566_v34 = vld [vmem:[#allocation10 + $0x1c8] ss:$16 sps:$4 sm:$0xff]   ;;  %v3085_v63 = vld [vmem:[#allocation10 + $0x104] ss:$16 sps:$4 sm:$0xff]  }
 0x19f   :  { %v2853_v15 = vpop.f32.mrf.mxu0  ;;  %1853 = vmatpush2.bf16.msra.mxu0 %v3065_v25  ;;  %v3077_v46 = vld [vmem:[#allocation10 + $0x120] ss:$16 sps:$4 sm:$0xff]   ;;  %v3572_v36 = vld [vmem:[#allocation10 + $0x1a8] ss:$16 sps:$4 sm:$0xff]   ;;  %v3583_v31 = vld [vmem:[#allocation10 + $0x16c] ss:$16 sps:$4 sm:$0xff]  }
 0x1a0   :  { %v973_v19 = vadd.f32 %v2852_v38, %v876_v29  ;;  %v1118_v51 = vpack.c.bf16 %v1108_v47, %v1107_v37  ;;  %v1093_v18 = vmul.f32 0.2, %v1067_v62  ;;  %1854 = vmatprep.subr.bf16.mxu0 %v3073_v4  ;;  %v3576_v29 = vld [vmem:[#allocation10 + $0x18c] ss:$16 sps:$4 sm:$0xff]   ;;  %v3591_v37 = vld [vmem:[#allocation10 + $0x148] ss:$16 sps:$4 sm:$0xff]  }
 0x1a1   :  { %v2854_v56 = vpop.f32.mrf.mxu0  ;;  %v3589_v38 = vld [vmem:[#allocation10 + $0x14c] ss:$16 sps:$4 sm:$0xff]  }
 0x1a2   :  { %v1070_v40 = vadd.f32 %v1069_v49, %v973_v19  ;;  %v2855_v48 = vadd.f32 %v2854_v56, %v2853_v15  ;;  %1312 = vmatmul.mubr.bf16.gmra.mxu1 %v1118_v51  ;;  %v1109_v45 = vmax.f32 %v1067_v62, %v1093_v18  ;;  %v3585_v62 = vld [vmem:[#allocation10 + $0x168] ss:$16 sps:$4 sm:$0xff]   ;;  %v3595_v47 = vld [vmem:[#allocation10 + $0x12c] ss:$16 sps:$4 sm:$0xff]   ;;  %v1139_v51 = vlaneseq }
 0x1a3   :  { %v2856_v11 = vpop.f32.mrf.mxu0  ;;  %1321 = vmatprep.mubr.bf16.mxu1 %v3284_v42  ;;  %v3597_v15 = vld [vmem:[#allocation10 + $0x128] ss:$16 sps:$4 sm:$0xff]   ;;  %v1137_v18 = vld [vmem:[#allocation8] sm:$0x3] }
 0x1a4   :  { %v1094_v21 = vmul.f32 0.2, %v1070_v40  ;;  %v978_v58 = vadd.f32 %v2855_v48, %v3456_v13  ;;  %v3558_v13 = vld [vmem:[#allocation10 + $0x1ec] ss:$16 sps:$4 sm:$0xff]   ;;  %v3603_v19 = vld [vmem:[#allocation10 + $0x108] ss:$16 sps:$4 sm:$0xff]  }
 0x1a5   :  { %v2857_v53 = vpop.f32.mrf.mxu0  ;;  %2894 = vmatprep.subr.bf16.mxu1 %v3558_v13  ;;  %v3607_v44 = vshrl.u32 %v1139_v51, 7 }
 0x1a6   :  { %v1075_v20 = vadd.f32 %v2884_v60, %v978_v58  ;;  %v2858_v57 = vadd.f32 %v2857_v53, %v2856_v11  ;;  %v1110_v12 = vmax.f32 %v1070_v40, %v1094_v21  ;;  %v3560_v60 = vld [vmem:[#allocation10 + $0x1e8] ss:$16 sps:$4 sm:$0xff]  }
 0x1a7   :  { %2910 = vmatpush2.bf16.msra.mxu1 %v3560_v60  ;;  %v3610_v49 = vsub.s32 1, %v3607_v44  ;;  %v3613_v56 = vsub.s32 0, %v3607_v44 }
 0x1a8   :  { %v981_v17 = vadd.f32 %v2858_v57, %v884_v39  ;;  %v1119_v26 = vpack.c.bf16 %v1110_v12, %v1109_v45  ;;  %v1095_v28 = vmul.f32 0.2, %v1075_v20  ;;  %2895 = vmatprep.subr.bf16.mxu1 %v3564_v9 }
 0x1a9   :  { %v3616_v40 = vrot.slane %v1137_v18, %v3610_v49  ;;  %v3619_v48 = vrot.slane %v1137_v18, %v3613_v56 }
 0x1aa   :  { %v1078_v52 = vadd.f32 %v2885_v32, %v981_v17  ;;  %1322 = vmatmul.mubr.bf16.gmra.mxu1 %v1119_v26  ;;  %v1111_v14 = vmax.f32 %v1075_v20, %v1095_v28  ;;  %v3578_v32 = vld [vmem:[#allocation10 + $0x188] ss:$16 sps:$4 sm:$0xff]  }
 0x1ab   :  { %1331 = vmatprep.mubr.bf16.mxu1 %v3284_v42  ;;  %v3071_v42 = vld [vmem:[#allocation10 + $0x140] ss:$16 sps:$4 sm:$0xff]   ;;  %2911 = vmatpush2.bf16.msra.mxu1 %v3566_v34 }
 0x1ac   :  { %v1096_v10 = vmul.f32 0.2, %v1078_v52  ;;  %1855 = vmatpush2.bf16.msra.mxu0 %v3071_v42  ;;  %2896 = vmatprep.subr.bf16.mxu1 %v3570_v41 }
 0x1ad   :  { %1856 = vmatprep.subr.bf16.mxu0 %v3079_v59 }
 0x1ae   :  { %v1112_v24 = vmax.f32 %v1078_v52, %v1096_v10 }
 0x1af   :  { %2912 = vmatpush2.bf16.msra.mxu1 %v3572_v36 }
 0x1b0   :  { %v1120_v54 = vpack.c.bf16 %v1112_v24, %v1111_v14  ;;  %1857 = vmatpush2.bf16.msra.mxu0 %v3077_v46  ;;  %2897 = vmatprep.subr.bf16.mxu1 %v3576_v29 }
 0x1b1   :  { %1858 = vmatprep.subr.bf16.mxu0 %v3085_v63 }
 0x1b2   :  { %1332 = vmatmul.mubr.bf16.gmra.mxu1 %v1120_v54 }
 0x1b3   :  { %2913 = vmatpush2.bf16.msra.mxu1 %v3578_v32 }
 0x1b4   :  { %1859 = vmatpush2.bf16.msra.mxu0 %v3083_v30  ;;  %2898 = vmatprep.subr.bf16.mxu1 %v3583_v31 }
 0x1b5   :  { %1941 = vmatprep.subr.bf16.mxu0 %v3385_v6  ;;  %v3601_v6 = vld [vmem:[#allocation10 + $0x10c] ss:$16 sps:$4 sm:$0xff]  }
 0x1b7   :  { %2914 = vmatpush2.bf16.msra.mxu1 %v3585_v62 }
 0x1b8   :  { %2899 = vmatprep.subr.bf16.mxu1 %v3589_v38 }
 0x1bb   :  { %2915 = vmatpush2.bf16.msra.mxu1 %v3591_v37 }
 0x1bc   :  { %2900 = vmatprep.subr.bf16.mxu1 %v3595_v47 }
 0x1bf   :  { %2916 = vmatpush2.bf16.msra.mxu1 %v3597_v15 }
 0x1c0   :  { %2901 = vmatprep.subr.bf16.mxu1 %v3601_v6 }
 0x1c3   :  { %2917 = vmatpush2.bf16.msra.mxu1 %v3603_v19 }
 0x23a   :  { %v1263_v5 = vpop.f32.mrf.mxu1 }
 0x23b   :  { %v1264_v58 = vadd.f32 %v1263_v5, %v3619_v48 }
 0x23c   :  { %v1265_v11 = vpop.f32.mrf.mxu1 }
 0x23d   :  { %v1266_v21 = vadd.f32 %v1265_v11, %v3616_v40  ;;  %v1342_v17 = vmul.f32 0.2, %v1264_v58 }
 0x23e   :  { %v1267_v39 = vpop.f32.mrf.mxu1 }
 0x23f   :  { %v1268_v53 = vadd.f32 %v1267_v39, %v3619_v48  ;;  %v1343_v57 = vmul.f32 0.2, %v1266_v21  ;;  %v1374_v23 = vmax.f32 %v1264_v58, %v1342_v17 }
 0x240   :  { %v1269_v20 = vpop.f32.mrf.mxu1 }
 0x241   :  { %v1344_v45 = vmul.f32 0.2, %v1268_v53  ;;  %v1270_v12 = vadd.f32 %v1269_v20, %v3616_v40  ;;  %v1375_v14 = vmax.f32 %v1266_v21, %v1343_v57 }
 0x242   :  { %v1273_v26 = vpop.f32.mrf.mxu1 }
 0x243   :  { %v1345_v28 = vmul.f32 0.2, %v1270_v12  ;;  %v1376_v52 = vmax.f32 %v1268_v53, %v1344_v45  ;;  %v1274_v25 = vadd.f32 %v1273_v26, %v3619_v48 }
 0x244   :  { %v1275_v10 = vpop.f32.mrf.mxu1 }
 0x245   :  { %v1377_v24 = vmax.f32 %v1270_v12, %v1345_v28  ;;  %v1276_v54 = vadd.f32 %v1275_v10, %v3616_v40  ;;  %v3630_v46 = vpack.c.bf16 %v1376_v52, %v1374_v23  ;;  %v1346_v5 = vmul.f32 0.2, %v1274_v25 }
 0x246   :  { %v1277_v4 = vpop.f32.mrf.mxu1 }
 0x247   :  { %v1278_v42 = vadd.f32 %v1277_v4, %v3619_v48  ;;  %v3628_v59 = vpack.c.bf16 %v1377_v24, %v1375_v14  ;;  %v1347_v30 = vmul.f32 0.2, %v1276_v54  ;;  %v1378_v45 = vmax.f32 %v1274_v25, %v1346_v5 }
 0x248   :  { %v1279_v63 = vpop.f32.mrf.mxu1 }
 0x249   :  { %v1348_v51 = vmul.f32 0.2, %v1278_v42  ;;  %v1280_v18 = vadd.f32 %v1279_v63, %v3616_v40  ;;  %1860 = vmatprep.mubr.bf16.mxu0 %v3628_v59  ;;  %v1379_v53 = vmax.f32 %v1276_v54, %v1347_v30 }
 0x24a   :  { %v1283_v11 = vpop.f32.mrf.mxu1  ;;  %1861 = vmatmul.mubr.bf16.vlgmr.msra.gmra.mxu0 %v3630_v46 }
 0x24b   :  { %v1349_v21 = vmul.f32 0.2, %v1280_v18  ;;  %1942 = vmatpush1.bf16.msra.mxu0 %v3472_v50  ;;  %v1380_v58 = vmax.f32 %v1278_v42, %v1348_v51  ;;  %v1284_v12 = vadd.f32 %v1283_v11, %v3619_v48 }
 0x24c   :  { %v1285_v39 = vpop.f32.mrf.mxu1  ;;  %1943 = vmatprep.subr.bf16.mxu0 %v3474_v3 }
 0x24d   :  { %v1381_v20 = vmax.f32 %v1280_v18, %v1349_v21  ;;  %v1286_v57 = vadd.f32 %v1285_v39, %v3616_v40  ;;  %v3643_v50 = vpack.c.bf16 %v1380_v58, %v1378_v45  ;;  %v1350_v24 = vmul.f32 0.2, %v1284_v12 }
 0x24e   :  { %v1287_v17 = vpop.f32.mrf.mxu1 }
 0x24f   :  { %v1288_v26 = vadd.f32 %v1287_v17, %v3619_v48  ;;  %1944 = vmatpush1.bf16.msra.mxu0 %v3481_v43  ;;  %v3641_v28 = vpack.c.bf16 %v1381_v20, %v1379_v53  ;;  %v1351_v3 = vmul.f32 0.2, %v1286_v57  ;;  %v1382_v63 = vmax.f32 %v1284_v12, %v1350_v24 }
 0x250   :  { %v1289_v52 = vpop.f32.mrf.mxu1  ;;  %1945 = vmatprep.subr.bf16.mxu0 %v3485_v1 }
 0x251   :  { %v1352_v10 = vmul.f32 0.2, %v1288_v26  ;;  %v1290_v14 = vadd.f32 %v1289_v52, %v3616_v40  ;;  %1870 = vmatprep.mubr.bf16.mxu0 %v3641_v28  ;;  %v1383_v4 = vmax.f32 %v1286_v57, %v1351_v3 }
 0x252   :  { %v1293_v54 = vpop.f32.mrf.mxu1  ;;  %1871 = vmatmul.mubr.bf16.gmra.mxu0 %v3643_v50 }
 0x253   :  { %v1353_v23 = vmul.f32 0.2, %v1290_v14  ;;  %1946 = vmatpush1.bf16.msra.mxu0 %v3490_v0  ;;  %v1384_v43 = vmax.f32 %v1288_v26, %v1352_v10  ;;  %v1294_v30 = vadd.f32 %v1293_v54, %v3619_v48 }
 0x254   :  { %v1295_v25 = vpop.f32.mrf.mxu1  ;;  %1947 = vmatprep.subr.bf16.mxu0 %v3493_v16 }
 0x255   :  { %v1385_v42 = vmax.f32 %v1290_v14, %v1353_v23  ;;  %v1296_v1 = vadd.f32 %v1295_v25, %v3616_v40  ;;  %v1410_v21 = vpack.c.bf16 %v1384_v43, %v1382_v63  ;;  %v1354_v39 = vmul.f32 0.2, %v1294_v30 }
 0x256   :  { %v1297_v51 = vpop.f32.mrf.mxu1 }
 0x257   :  { %v1298_v18 = vadd.f32 %v1297_v51, %v3619_v48  ;;  %1948 = vmatpush1.bf16.msra.mxu0 %v3500_v35  ;;  %v1411_v5 = vpack.c.bf16 %v1385_v42, %v1383_v4  ;;  %v1355_v0 = vmul.f32 0.2, %v1296_v1  ;;  %v1386_v17 = vmax.f32 %v1294_v30, %v1354_v39 }
 0x258   :  { %v1299_v11 = vpop.f32.mrf.mxu1  ;;  %1949 = vmatprep.subr.bf16.mxu0 %v3504_v7 }
 0x259   :  { %v1356_v58 = vmul.f32 0.2, %v1298_v18  ;;  %v1300_v16 = vadd.f32 %v1299_v11, %v3616_v40  ;;  %1880 = vmatprep.mubr.bf16.mxu0 %v1411_v5  ;;  %1993 = vmatprep.mubr.bf16.mxu1 %v1411_v5  ;;  %v1387_v45 = vmax.f32 %v1296_v1, %v1355_v0 }
 0x25a   :  { %v1303_v53 = vpop.f32.mrf.mxu1  ;;  %1881 = vmatmul.mubr.bf16.gmra.mxu0 %v1410_v21  ;;  %1994 = vmatmul.mubr.bf16.vlgmr.msra.gmra.mxu1 %v1410_v21 }
 0x25b   :  { %v1357_v20 = vmul.f32 0.2, %v1300_v16  ;;  %1950 = vmatpush1.bf16.msra.mxu0 %v3509_v61  ;;  %v1388_v57 = vmax.f32 %v1298_v18, %v1356_v58  ;;  %v1304_v26 = vadd.f32 %v1303_v53, %v3619_v48 }
 0x25c   :  { %v1305_v35 = vpop.f32.mrf.mxu1  ;;  %1951 = vmatprep.subr.bf16.mxu0 %v3512_v2 }
 0x25d   :  { %v1389_v12 = vmax.f32 %v1300_v16, %v1357_v20  ;;  %v1306_v7 = vadd.f32 %v1305_v35, %v3616_v40  ;;  %v1412_v24 = vpack.c.bf16 %v1388_v57, %v1386_v17  ;;  %v1358_v23 = vmul.f32 0.2, %v1304_v26 }
 0x25e   :  { %v1307_v52 = vpop.f32.mrf.mxu1 }
 0x25f   :  { %v1308_v3 = vadd.f32 %v1307_v52, %v3619_v48  ;;  %1952 = vmatpush1.bf16.msra.mxu0 %v3519_v55  ;;  %v1413_v10 = vpack.c.bf16 %v1389_v12, %v1387_v45  ;;  %v1359_v61 = vmul.f32 0.2, %v1306_v7  ;;  %v1390_v63 = vmax.f32 %v1304_v26, %v1358_v23 }
 0x260   :  { %v1309_v14 = vpop.f32.mrf.mxu1  ;;  %1953 = vmatprep.subr.bf16.mxu0 %v3523_v27 }
 0x261   :  { %v1360_v54 = vmul.f32 0.2, %v1308_v3  ;;  %v1310_v2 = vadd.f32 %v1309_v14, %v3616_v40  ;;  %1890 = vmatprep.mubr.bf16.mxu0 %v1413_v10  ;;  %2003 = vmatprep.mubr.bf16.mxu1 %v1413_v10  ;;  %v1391_v42 = vmax.f32 %v1306_v7, %v1359_v61 }
 0x262   :  { %v1313_v43 = vpop.f32.mrf.mxu1  ;;  %1891 = vmatmul.mubr.bf16.gmra.mxu0 %v1412_v24  ;;  %2004 = vmatmul.mubr.bf16.gmra.mxu1 %v1412_v24 }
 0x263   :  { %v1361_v25 = vmul.f32 0.2, %v1310_v2  ;;  %1954 = vmatpush1.bf16.msra.mxu0 %v3528_v33  ;;  %v1392_v4 = vmax.f32 %v1308_v3, %v1360_v54  ;;  %v1314_v30 = vadd.f32 %v1313_v43, %v3619_v48 }
 0x264   :  { %v1315_v55 = vpop.f32.mrf.mxu1  ;;  %1955 = vmatprep.subr.bf16.mxu0 %v3531_v8 }
 0x265   :  { %v1393_v1 = vmax.f32 %v1310_v2, %v1361_v25  ;;  %v1316_v27 = vadd.f32 %v1315_v55, %v3616_v40  ;;  %v1414_v21 = vpack.c.bf16 %v1392_v4, %v1390_v63  ;;  %v1362_v58 = vmul.f32 0.2, %v1314_v30 }
 0x266   :  { %v1317_v51 = vpop.f32.mrf.mxu1 }
 0x267   :  { %v1318_v18 = vadd.f32 %v1317_v51, %v3619_v48  ;;  %1956 = vmatpush1.bf16.msra.mxu0 %v3538_v22  ;;  %v1415_v5 = vpack.c.bf16 %v1393_v1, %v1391_v42  ;;  %v1363_v33 = vmul.f32 0.2, %v1316_v27  ;;  %v1394_v35 = vmax.f32 %v1314_v30, %v1362_v58 }
 0x268   :  { %v1319_v11 = vpop.f32.mrf.mxu1  ;;  %1957 = vmatprep.subr.bf16.mxu0 %v3558_v13  ;;  %v1498_v58 = vsub.s32 2, %v3607_v44 }
 0x269   :  { %v1364_v0 = vmul.f32 0.2, %v1318_v18  ;;  %v1320_v8 = vadd.f32 %v1319_v11, %v3616_v40  ;;  %1900 = vmatprep.mubr.bf16.mxu0 %v1415_v5  ;;  %2013 = vmatprep.mubr.bf16.mxu1 %v1415_v5  ;;  %v1395_v20 = vmax.f32 %v1316_v27, %v1363_v33 }
 0x26a   :  { %v1323_v16 = vpop.f32.mrf.mxu1  ;;  %1901 = vmatmul.mubr.bf16.gmra.mxu0 %v1414_v21  ;;  %2014 = vmatmul.mubr.bf16.gmra.mxu1 %v1414_v21 }
 0x26b   :  { %v1365_v39 = vmul.f32 0.2, %v1320_v8  ;;  %1958 = vmatpush2.bf16.msra.mxu0 %v3560_v60  ;;  %v1396_v53 = vmax.f32 %v1318_v18, %v1364_v0  ;;  %v1324_v45 = vadd.f32 %v1323_v16, %v3619_v48  ;;  %v2182_v16 = vld [vmem:[%s4045_s7] sm:$0xf] }
 0x26c   :  { %v1325_v22 = vpop.f32.mrf.mxu1  ;;  %1959 = vmatprep.subr.bf16.mxu0 %v3564_v9 }
 0x26d   :  { %v1397_v57 = vmax.f32 %v1320_v8, %v1365_v39  ;;  %v1326_v13 = vadd.f32 %v1325_v22, %v3616_v40  ;;  %v1416_v52 = vpack.c.bf16 %v1396_v53, %v1394_v35  ;;  %v1366_v10 = vmul.f32 0.2, %v1324_v45 }
 0x26e   :  { %v1327_v12 = vpop.f32.mrf.mxu1 }
 0x26f   :  { %v1328_v7 = vadd.f32 %v1327_v12, %v3619_v48  ;;  %1960 = vmatpush2.bf16.msra.mxu0 %v3566_v34  ;;  %v1417_v17 = vpack.c.bf16 %v1397_v57, %v1395_v20  ;;  %v1367_v60 = vmul.f32 0.2, %v1326_v13  ;;  %v1398_v23 = vmax.f32 %v1324_v45, %v1366_v10 }
 0x270   :  { %v1329_v26 = vpop.f32.mrf.mxu1  ;;  %1961 = vmatprep.subr.bf16.mxu0 %v3570_v41  ;;  %v3720_v20 = vrot.slane %v2182_v16, %v3610_v49 }
 0x271   :  { %v1368_v3 = vmul.f32 0.2, %v1328_v7  ;;  %v1330_v9 = vadd.f32 %v1329_v26, %v3616_v40  ;;  %1910 = vmatprep.mubr.bf16.mxu0 %v1417_v17  ;;  %2023 = vmatprep.mubr.bf16.mxu1 %v1417_v17  ;;  %v1399_v54 = vmax.f32 %v1326_v13, %v1367_v60  ;;  %v1502_v13 = vsub.s32 3, %v3607_v44 }
 0x272   :  { %v1333_v14 = vpop.f32.mrf.mxu1  ;;  %1911 = vmatmul.mubr.bf16.gmra.mxu0 %v1416_v52  ;;  %2024 = vmatmul.mubr.bf16.gmra.mxu1 %v1416_v52  ;;  %v3725_v26 = vrot.slane %v2182_v16, %v3613_v56 }
 0x273   :  { %v1369_v24 = vmul.f32 0.2, %v1330_v9  ;;  %1962 = vmatpush2.bf16.msra.mxu0 %v3572_v36  ;;  %v1400_v61 = vmax.f32 %v1328_v7, %v1368_v3  ;;  %v1334_v43 = vadd.f32 %v1333_v14, %v3619_v48 }
 0x274   :  { %v1335_v34 = vpop.f32.mrf.mxu1  ;;  %1963 = vmatprep.subr.bf16.mxu0 %v3576_v29 }
 0x275   :  { %v1401_v2 = vmax.f32 %v1330_v9, %v1369_v24  ;;  %v1336_v41 = vadd.f32 %v1335_v34, %v3616_v40  ;;  %v1418_v1 = vpack.c.bf16 %v1400_v61, %v1398_v23  ;;  %v1370_v63 = vmul.f32 0.2, %v1334_v43 }
 0x276   :  { %v1337_v25 = vpop.f32.mrf.mxu1 }
 0x277   :  { %v1338_v4 = vadd.f32 %v1337_v25, %v3619_v48  ;;  %1964 = vmatpush2.bf16.msra.mxu0 %v3578_v32  ;;  %v1419_v55 = vpack.c.bf16 %v1401_v2, %v1399_v54  ;;  %v1371_v36 = vmul.f32 0.2, %v1336_v41  ;;  %v1402_v18 = vmax.f32 %v1334_v43, %v1370_v63 }
 0x278   :  { %v1339_v42 = vpop.f32.mrf.mxu1  ;;  %1965 = vmatprep.subr.bf16.mxu0 %v3583_v31  ;;  %v3735_v2 = vrot.slane %v2182_v16, %v1498_v58 }
 0x279   :  { %v1372_v27 = vmul.f32 0.2, %v1338_v4  ;;  %v1340_v29 = vadd.f32 %v1339_v42, %v3616_v40  ;;  %1920 = vmatprep.mubr.bf16.mxu0 %v1419_v55  ;;  %2033 = vmatprep.mubr.bf16.mxu1 %v1419_v55  ;;  %v1403_v32 = vmax.f32 %v1336_v41, %v1371_v36  ;;  %v3739_v55 = vrot.slane %v2182_v16, %v1502_v13 }
 0x27a   :  { %1921 = vmatmul.mubr.bf16.gmra.mxu0 %v1418_v1  ;;  %2034 = vmatmul.mubr.bf16.gmra.mxu1 %v1418_v1 }
 0x27b   :  { %v1373_v30 = vmul.f32 0.2, %v1340_v29  ;;  %1966 = vmatpush2.bf16.msra.mxu0 %v3585_v62  ;;  %v1404_v48 = vmax.f32 %v1338_v4, %v1372_v27  ;;  %v1486_v62 = vld [vmem:[%s4044_s6] sm:$0xf] }
 0x27c   :  { %1967 = vmatprep.subr.bf16.mxu0 %v3589_v38  ;;  %v3727_v60 = vrot.slane %v1486_v62, %v1498_v58  ;;  %v3731_v61 = vrot.slane %v1486_v62, %v1502_v13 }
 0x27d   :  { %v1405_v51 = vmax.f32 %v1340_v29, %v1373_v30  ;;  %v1420_v5 = vpack.c.bf16 %v1404_v48, %v1402_v18 }
 0x27f   :  { %1968 = vmatpush2.bf16.msra.mxu0 %v3591_v37  ;;  %v1421_v31 = vpack.c.bf16 %v1405_v51, %v1403_v32  ;;  %v3704_v37 = vrot.slane %v1486_v62, %v3610_v49 }
 0x280   :  { %1969 = vmatprep.subr.bf16.mxu0 %v3595_v47  ;;  %v3707_v47 = vrot.slane %v1486_v62, %v3613_v56 }
 0x281   :  { %1930 = vmatprep.mubr.bf16.mxu0 %v1421_v31  ;;  %2043 = vmatprep.mubr.bf16.mxu1 %v1421_v31 }
 0x282   :  { %1931 = vmatmul.mubr.bf16.gmra.mxu0 %v1420_v5  ;;  %2044 = vmatmul.mubr.bf16.gmra.mxu1 %v1420_v5 }
 0x283   :  { %1970 = vmatpush2.bf16.msra.mxu0 %v3597_v15  ;;  %1973 = vmatprep.mubr.bf16.mxu0 %v3628_v59 }
 0x284   :  { %1971 = vmatprep.subr.bf16.mxu0 %v3601_v6 }
 0x287   :  { %1972 = vmatpush2.bf16.msra.mxu0 %v3603_v19 }
 0x28a   :  { %1974 = vmatmul.mubr.bf16.vlgmr.msra.gmra.mxu0 %v3630_v46 }
 0x28b   :  { %1983 = vmatprep.mubr.bf16.mxu0 %v3641_v28 }
 0x292   :  { %1984 = vmatmul.mubr.bf16.gmra.mxu0 %v3643_v50 }
 0x30a   :  { %v1862_v38 = vpop.f32.mrf.mxu0 }
 0x30b   :  { %v1863_v40 = vadd.f32 %v1862_v38, %v3707_v47 }
 0x30c   :  { %v1864_v15 = vpop.f32.mrf.mxu0 }
 0x30d   :  { %v1865_v6 = vadd.f32 %v1864_v15, %v3704_v37  ;;  %v2054_v0 = vmul.f32 0.2, %v1863_v40 }
 0x30e   :  { %v1866_v19 = vpop.f32.mrf.mxu0 }
 0x30f   :  { %v1867_v46 = vadd.f32 %v1866_v19, %v3707_v47  ;;  %v2055_v50 = vmul.f32 0.2, %v1865_v6  ;;  %v2118_v17 = vmax.f32 %v1863_v40, %v2054_v0 }
 0x310   :  { %v1868_v59 = vpop.f32.mrf.mxu0 }
 0x311   :  { %v1869_v28 = vadd.f32 %v1868_v59, %v3704_v37  ;;  %v2058_v39 = vmul.f32 0.2, %v1867_v46  ;;  %v2119_v22 = vmax.f32 %v1865_v6, %v2055_v50  ;;  %v2204_v41 = vmul.f32 %v3725_v26, %v2118_v17 }
 0x312   :  { %v1872_v11 = vpop.f32.mrf.mxu0 }
 0x313   :  { %v2059_v21 = vmul.f32 0.2, %v1869_v28  ;;  %v1873_v33 = vadd.f32 %v1872_v11, %v3707_v47  ;;  %v2122_v3 = vmax.f32 %v1867_v46, %v2058_v39  ;;  %v2205_v10 = vmul.f32 %v3720_v20, %v2119_v22 }
 0x314   :  { %v1874_v8 = vpop.f32.mrf.mxu0 }
 0x315   :  { %v1875_v53 = vadd.f32 %v1874_v8, %v3704_v37  ;;  %v2123_v35 = vmax.f32 %v1869_v28, %v2059_v21  ;;  %v2062_v45 = vmul.f32 0.2, %v1873_v33  ;;  %v2208_v42 = vmul.f32 %v3725_v26, %v2122_v3 }
 0x316   :  { %v1876_v57 = vpop.f32.mrf.mxu0  ;;  %v3745_v51 = vadd.f32 %v2205_v10, %v2204_v41 }
 0x317   :  { %v2063_v12 = vmul.f32 0.2, %v1875_v53  ;;  %v1877_v7 = vadd.f32 %v1876_v57, %v3707_v47  ;;  %v2209_v34 = vmul.f32 %v3720_v20, %v2123_v35  ;;  %v2126_v54 = vmax.f32 %v1873_v33, %v2062_v45 }
 0x318   :  { %v1878_v52 = vpop.f32.mrf.mxu0 }
 0x319   :  { %v2066_v9 = vmul.f32 0.2, %v1877_v7  ;;  %v1879_v49 = vadd.f32 %v1878_v52, %v3704_v37  ;;  %v2127_v14 = vmax.f32 %v1875_v53, %v2063_v12  ;;  %v2212_v18 = vmul.f32 %v3725_v26, %v2126_v54 }
 0x31a   :  { %v1882_v44 = vpop.f32.mrf.mxu0  ;;  %v1995_v24 = vpop.f32.mrf.mxu1  ;;  %v3749_v62 = vadd.f32 %v2209_v34, %v2208_v42 }
 0x31b   :  { %v1883_v56 = vadd.f32 %v1882_v44, %v3707_v47  ;;  %v2130_v23 = vmax.f32 %v1877_v7, %v2066_v9  ;;  %v1996_v43 = vadd.f32 %v1995_v24, %v3727_v60  ;;  %v2067_v1 = vmul.f32 0.2, %v1879_v49 }
 0x31c   :  { %v1884_v25 = vpop.f32.mrf.mxu0  ;;  %v1997_v4 = vpop.f32.mrf.mxu1  ;;  %v2213_v29 = vmul.f32 %v3720_v20, %v2127_v14 }
 0x31d   :  { %v2070_v36 = vmul.f32 0.2, %v1883_v56  ;;  %v1885_v27 = vadd.f32 %v1884_v25, %v3704_v37  ;;  %v2072_v63 = vmul.f32 0.2, %v1996_v43  ;;  %v1998_v30 = vadd.f32 %v1997_v4, %v3731_v61 }
 0x31e   :  { %v1886_v48 = vpop.f32.mrf.mxu0  ;;  %v1999_v32 = vpop.f32.mrf.mxu1  ;;  %v3752_v38 = vmul.f32 %v3725_v26, %v2130_v23  ;;  %v2131_v46 = vmax.f32 %v1879_v49, %v2067_v1  ;;  %v3761_v16 = vadd.f32 %v2213_v29, %v2212_v18 }
 0x31f   :  { %v2071_v31 = vmul.f32 0.2, %v1885_v27  ;;  %v1887_v5 = vadd.f32 %v1886_v48, %v3707_v47  ;;  %v2134_v15 = vmax.f32 %v1883_v56, %v2070_v36  ;;  %v2073_v6 = vmul.f32 0.2, %v1998_v30 }
 0x320   :  { %v3755_v19 = vadd.f32 %v1999_v32, %v3727_v60  ;;  %v1888_v40 = vpop.f32.mrf.mxu0  ;;  %v2001_v59 = vpop.f32.mrf.mxu1  ;;  %v2136_v21 = vmax.f32 %v1996_v43, %v2072_v63  ;;  %v3774_v52 = vmul.f32 %v3720_v20, %v2131_v46 }
 0x321   :  { %v2135_v28 = vmax.f32 %v1885_v27, %v2071_v31  ;;  %v2074_v50 = vmul.f32 0.2, %v1887_v5  ;;  %v1889_v11 = vadd.f32 %v1888_v40, %v3704_v37  ;;  %v2137_v33 = vmax.f32 %v1998_v30, %v2073_v6 }
 0x322   :  { %v3759_v0 = vadd.f32 %v2001_v59, %v3731_v61  ;;  %v1892_v8 = vpop.f32.mrf.mxu0  ;;  %v2005_v58 = vpop.f32.mrf.mxu1  ;;  %v3765_v53 = vmul.f32 0.2, %v3755_v19  ;;  %v2220_v13 = vmul.f32 %v3725_v26, %v2134_v15  ;;  %v2222_v34 = vmul.f32 %v3735_v2, %v2136_v21 }
 0x323   :  { %v2221_v39 = vmul.f32 %v3720_v20, %v2135_v28  ;;  %v2075_v22 = vmul.f32 0.2, %v1889_v11  ;;  %v1893_v57 = vadd.f32 %v1892_v8, %v3707_v47  ;;  %v2138_v35 = vmax.f32 %v1887_v5, %v2074_v50 }
 0x324   :  { %v3770_v45 = vmul.f32 0.2, %v3759_v0  ;;  %v2006_v12 = vadd.f32 %v2005_v58, %v3727_v60  ;;  %v1894_v7 = vpop.f32.mrf.mxu0  ;;  %v2007_v17 = vpop.f32.mrf.mxu1  ;;  %v2140_v56 = vmax.f32 %v3755_v19, %v3765_v53  ;;  %v2223_v43 = vmul.f32 %v3739_v55, %v2137_v33 }
 0x325   :  { %v2139_v3 = vmax.f32 %v1889_v11, %v2075_v22  ;;  %v2078_v9 = vmul.f32 0.2, %v1893_v57  ;;  %v1895_v49 = vadd.f32 %v1894_v7, %v3704_v37  ;;  %v3778_v14 = vadd.f32 %v2007_v17, %v3731_v61 }
 0x326   :  { %v2080_v10 = vmul.f32 0.2, %v2006_v12  ;;  %v1896_v44 = vpop.f32.mrf.mxu0  ;;  %v2009_v24 = vpop.f32.mrf.mxu1  ;;  %v2288_v54 = vadd.f32 %v2221_v39, %v2220_v13  ;;  %v2224_v25 = vmul.f32 %v3725_v26, %v2138_v35  ;;  %v2141_v4 = vmax.f32 %v3759_v0, %v3770_v45 }
 0x327   :  { %v2079_v41 = vmul.f32 0.2, %v1895_v49  ;;  %v1897_v23 = vadd.f32 %v1896_v44, %v3707_v47  ;;  %v2010_v42 = vadd.f32 %v2009_v24, %v3727_v60  ;;  %v2225_v29 = vmul.f32 %v3720_v20, %v2139_v3 }
 0x328   :  { %v1898_v1 = vpop.f32.mrf.mxu0  ;;  %v2011_v36 = vpop.f32.mrf.mxu1  ;;  %v2289_v27 = vadd.f32 %v2288_v54, %v2222_v34  ;;  %v2142_v63 = vmax.f32 %v1893_v57, %v2078_v9  ;;  %v2144_v32 = vmax.f32 %v2006_v12, %v2080_v10  ;;  %v3792_v18 = vmul.f32 0.2, %v3778_v14 }
 0x329   :  { %v2082_v30 = vmul.f32 0.2, %v1897_v23  ;;  %v1899_v48 = vadd.f32 %v1898_v1, %v3704_v37  ;;  %v2084_v31 = vmul.f32 0.2, %v2010_v42  ;;  %v3795_v5 = vadd.f32 %v2011_v36, %v3731_v61 }
 0x32a   :  { %v1902_v15 = vpop.f32.mrf.mxu0  ;;  %v2015_v6 = vpop.f32.mrf.mxu1  ;;  %v2143_v19 = vmax.f32 %v1895_v49, %v2079_v41  ;;  %v2290_v21 = vadd.f32 %v2289_v27, %v2223_v43  ;;  %v2228_v8 = vmul.f32 %v3725_v26, %v2142_v63  ;;  %v2230_v22 = vmul.f32 %v3735_v2, %v2144_v32 }
 0x32b   :  { %v2146_v40 = vmax.f32 %v1897_v23, %v2082_v30  ;;  %v2083_v59 = vmul.f32 0.2, %v1899_v48  ;;  %v1903_v46 = vadd.f32 %v1902_v15, %v3707_v47  ;;  %v2148_v28 = vmax.f32 %v2010_v42, %v2084_v31 }
 0x32c   :  { %v3799_v50 = vmul.f32 0.2, %v3795_v5  ;;  %v2016_v11 = vadd.f32 %v2015_v6, %v3727_v60  ;;  %v1904_v33 = vpop.f32.mrf.mxu0  ;;  %v2017_v0 = vpop.f32.mrf.mxu1  ;;  %v2145_v57 = vmax.f32 %v3778_v14, %v3792_v18  ;;  %2291 = vadd.xlane.f32.xlu0 %v2290_v21  ;;  %v2229_v7 = vmul.f32 %v3720_v20, %v2143_v19 }
 0x32d   :  { %v2147_v58 = vmax.f32 %v1899_v48, %v2083_v59  ;;  %v2086_v39 = vmul.f32 0.2, %v1903_v46  ;;  %v1905_v53 = vadd.f32 %v1904_v33, %v3704_v37  ;;  %v3808_v35 = vadd.f32 %v2017_v0, %v3731_v61 }
 0x32e   :  { %v2088_v13 = vmul.f32 0.2, %v2016_v11  ;;  %v1906_v45 = vpop.f32.mrf.mxu0  ;;  %v2019_v12 = vpop.f32.mrf.mxu1  ;;  %v3813_v49 = vmul.f32 %v3725_v26, %v2146_v40  ;;  %v3816_v10 = vmul.f32 %v3735_v2, %v2148_v28  ;;  %v2149_v14 = vmax.f32 %v3795_v5, %v3799_v50 }
 0x32f   :  { %v2150_v17 = vmax.f32 %v1903_v46, %v2086_v39  ;;  %v2087_v3 = vmul.f32 0.2, %v1905_v53  ;;  %v1907_v9 = vadd.f32 %v1906_v45, %v3707_v47  ;;  %v2020_v44 = vadd.f32 %v2019_v12, %v3727_v60 }
 0x330   :  { %v1908_v24 = vpop.f32.mrf.mxu0  ;;  %v2021_v34 = vpop.f32.mrf.mxu1  ;;  %v2233_v54 = vmul.f32 %v3720_v20, %v2147_v58  ;;  %v2152_v41 = vmax.f32 %v2016_v11, %v2088_v13  ;;  %v3823_v23 = vmul.f32 0.2, %v3808_v35  ;;  %v2226_v36 = vmul.f32 %v3735_v2, %v2140_v56 }
 0x331   :  { %v2090_v43 = vmul.f32 0.2, %v1907_v9  ;;  %v3826_v42 = vmul.f32 %v3725_v26, %v2150_v17  ;;  %v2092_v1 = vmul.f32 0.2, %v2020_v44  ;;  %v2293_v27 = vadd.f32 %v2225_v29, %v2224_v25 }
 0x332   :  { %v1912_v63 = vpop.f32.mrf.mxu0  ;;  %v2025_v30 = vpop.f32.mrf.mxu1  ;;  %v2151_v48 = vmax.f32 %v1905_v53, %v2087_v3  ;;  %v2227_v32 = vmul.f32 %v3739_v55, %v2141_v4  ;;  %v1909_v18 = vadd.f32 %v1908_v24, %v3704_v37  ;;  %v3832_v31 = vadd.f32 %v2021_v34, %v3731_v61 }
 0x333   :  { %v2154_v15 = vmax.f32 %v1907_v9, %v2090_v43  ;;  %v2294_v6 = vadd.f32 %v2293_v27, %v2226_v36  ;;  %v1913_v19 = vadd.f32 %v1912_v63, %v3707_v47  ;;  %v2026_v40 = vadd.f32 %v2025_v30, %v3727_v60 }
 0x334   :  { %v1914_v59 = vpop.f32.mrf.mxu0  ;;  %v2027_v46 = vpop.f32.mrf.mxu1  ;;  %v3837_v56 = vmul.f32 %v3735_v2, %v2152_v41  ;;  %v2153_v25 = vmax.f32 %v3808_v35, %v3823_v23  ;;  %v2156_v4 = vmax.f32 %v2020_v44, %v2092_v1  ;;  %v2091_v29 = vmul.f32 0.2, %v1909_v18 }
 0x335   :  { %v2295_v28 = vadd.f32 %v2294_v6, %v2227_v32  ;;  %v3842_v11 = vmul.f32 0.2, %v3832_v31  ;;  %v2094_v21 = vmul.f32 0.2, %v1913_v19  ;;  %v2096_v33 = vmul.f32 0.2, %v2026_v40 }
 0x336   :  { %v1916_v0 = vpop.f32.mrf.mxu0  ;;  %v2029_v58 = vpop.f32.mrf.mxu1  ;;  %v2237_v39 = vmul.f32 %v3720_v20, %v2151_v48  ;;  %v2155_v53 = vmax.f32 %v1909_v18, %v2091_v29  ;;  %v2298_v13 = vadd.f32 %v2229_v7, %v2228_v8  ;;  %v1915_v45 = vadd.f32 %v1914_v59, %v3704_v37 }
 0x337   :  { %v3847_v12 = vmul.f32 %v3725_v26, %v2154_v15  ;;  %2296 = vadd.xlane.f32.xlu1 %v2295_v28  ;;  %v2158_v17 = vmax.f32 %v1913_v19, %v2094_v21  ;;  %v3850_v3 = vadd.f32 %v2027_v46, %v3731_v61  ;;  %v1917_v9 = vadd.f32 %v1916_v0, %v3707_v47 }
 0x338   :  { %v1918_v44 = vpop.f32.mrf.mxu0  ;;  %v2031_v24 = vpop.f32.mrf.mxu1  ;;  %v2231_v34 = vmul.f32 %v3739_v55, %v2145_v57  ;;  %v2299_v41 = vadd.f32 %v2298_v13, %v2230_v22  ;;  %v2095_v43 = vmul.f32 0.2, %v1915_v45  ;;  %v2030_v8 = vadd.f32 %v2029_v58, %v3727_v60 }
 0x339   :  { %v3856_v7 = vmul.f32 %v3735_v2, %v2156_v4  ;;  %v2157_v1 = vmax.f32 %v3832_v31, %v3842_v11  ;;  %v2160_v36 = vmax.f32 %v2026_v40, %v2096_v33  ;;  %v2098_v27 = vmul.f32 0.2, %v1917_v9 }
 0x33a   :  { %v1922_v63 = vpop.f32.mrf.mxu0  ;;  %v2035_v30 = vpop.f32.mrf.mxu1  ;;  %v2241_v48 = vmul.f32 %v3720_v20, %v2155_v53  ;;  %v2300_v32 = vadd.f32 %v2299_v41, %v2231_v34  ;;  %v3862_v18 = vmul.f32 0.2, %v3850_v3  ;;  %v2100_v22 = vmul.f32 0.2, %v2030_v8 }
 0x33b   :  { %v3865_v57 = vmul.f32 %v3725_v26, %v2158_v17  ;;  %v2159_v15 = vmax.f32 %v1915_v45, %v2095_v43  ;;  %v2303_v6 = vadd.f32 %v2233_v54, %v3813_v49  ;;  %v1919_v19 = vadd.f32 %v1918_v44, %v3704_v37 }
 0x33c   :  { %v1924_v59 = vpop.f32.mrf.mxu0  ;;  %v2037_v40 = vpop.f32.mrf.mxu1  ;;  %2301 = vadd.xlane.f32.xlu0 %v2300_v32  ;;  %v2162_v46 = vmax.f32 %v1917_v9, %v2098_v27  ;;  %v2235_v4 = vmul.f32 %v3739_v55, %v2149_v14  ;;  %v3874_v29 = vadd.f32 %v2031_v24, %v3731_v61  ;;  %v1923_v28 = vadd.f32 %v1922_v63, %v3707_v47 }
 0x33d   :  { %v2164_v21 = vmax.f32 %v2030_v8, %v2100_v22  ;;  %v2304_v33 = vadd.f32 %v2303_v6, %v3816_v10  ;;  %v2099_v49 = vmul.f32 0.2, %v1919_v19  ;;  %v2036_v54 = vadd.f32 %v2035_v30, %v3727_v60 }
 0x33e   :  { %v1926_v0 = vpop.f32.mrf.mxu0  ;;  %v2039_v58 = vpop.f32.mrf.mxu1  ;;  %v3880_v53 = vmul.f32 %v3735_v2, %v2160_v36  ;;  %v2161_v5 = vmax.f32 %v3850_v3, %v3862_v18  ;;  %v3885_v50 = vmul.f32 0.2, %v3874_v29  ;;  %v2102_v14 = vmul.f32 0.2, %v1923_v28 }
 0x33f   :  { %v2305_v13 = vadd.f32 %v2304_v33, %v2235_v4  ;;  %v2163_v45 = vmax.f32 %v1919_v19, %v2099_v49  ;;  %v2104_v17 = vmul.f32 0.2, %v2036_v54  ;;  %v2308_v10 = vadd.f32 %v2237_v39, %v3826_v42 }
 0x340   :  { %v1928_v9 = vpop.f32.mrf.mxu0  ;;  %v2041_v44 = vpop.f32.mrf.mxu1  ;;  %v2245_v24 = vmul.f32 %v3720_v20, %v2159_v15  ;;  %v3890_v34 = vmul.f32 %v3725_v26, %v2162_v46  ;;  %v1925_v41 = vadd.f32 %v1924_v59, %v3704_v37  ;;  %v3894_v43 = vadd.f32 %v2037_v40, %v3731_v61 }
 0x341   :  { %v3897_v8 = vmul.f32 %v3735_v2, %v2164_v21  ;;  %2306 = vadd.xlane.f32.xlu1 %v2305_v13  ;;  %v2239_v42 = vmul.f32 %v3739_v55, %v2153_v25  ;;  %v2309_v39 = vadd.f32 %v2308_v10, %v3837_v56  ;;  %v1927_v36 = vadd.f32 %v1926_v0, %v3707_v47 }
 0x342   :  { %v1932_v27 = vpop.f32.mrf.mxu0  ;;  %v2045_v63 = vpop.f32.mrf.mxu1  ;;  %v2165_v30 = vmax.f32 %v3874_v29, %v3885_v50  ;;  %v2166_v32 = vmax.f32 %v1923_v28, %v2102_v14  ;;  %v2103_v22 = vmul.f32 0.2, %v1925_v41  ;;  %v2040_v15 = vadd.f32 %v2039_v58, %v3727_v60 }
 0x343   :  { %v2249_v6 = vmul.f32 %v3720_v20, %v2163_v45  ;;  %v2168_v19 = vmax.f32 %v2036_v54, %v2104_v17  ;;  %v2310_v59 = vadd.f32 %v2309_v39, %v2239_v42  ;;  %v2106_v35 = vmul.f32 0.2, %v1927_v36 }
 0x344   :  { %v1934_v23 = vpop.f32.mrf.mxu0  ;;  %v2167_v25 = vmax.f32 %v1925_v41, %v2103_v22  ;;  %v3910_v56 = vmul.f32 0.2, %v3894_v43  ;;  %v2108_v40 = vmul.f32 0.2, %v2040_v15  ;;  %v2313_v46 = vadd.f32 %v2241_v48, %v3847_v12  ;;  %v2047_v4 = vpop.f32.mrf.mxu1 }
 0x345   :  { %2311 = vadd.xlane.f32.xlu0 %v2310_v59  ;;  %v2170_v21 = vmax.f32 %v1927_v36, %v2106_v35  ;;  %v1929_v28 = vadd.f32 %v1928_v9, %v3704_v37  ;;  %v3915_v33 = vadd.f32 %v2041_v44, %v3731_v61  ;;  %v1933_v49 = vadd.f32 %v1932_v27, %v3707_v47 }
 0x346   :  { %v1936_v54 = vpop.f32.mrf.mxu0  ;;  %v2172_v0 = vmax.f32 %v2040_v15, %v2108_v40  ;;  %v2243_v58 = vmul.f32 %v3739_v55, %v2157_v1  ;;  %v2314_v14 = vadd.f32 %v2313_v46, %v3856_v7  ;;  %v2046_v12 = vadd.f32 %v2045_v63, %v3727_v60  ;;  %v2049_v1 = vpop.f32.mrf.mxu1 }
 0x347   :  { %v2252_v48 = vmul.f32 %v3725_v26, %v2166_v32  ;;  %v3926_v13 = vmul.f32 %v3735_v2, %v2168_v19  ;;  %v2107_v45 = vmul.f32 0.2, %v1929_v28  ;;  %v2110_v17 = vmul.f32 0.2, %v1933_v49 }
 0x348   :  { %v1938_v10 = vpop.f32.mrf.mxu0  ;;  %v2253_v9 = vmul.f32 %v3720_v20, %v2167_v25  ;;  %v2169_v44 = vmax.f32 %v3894_v43, %v3910_v56  ;;  %v2315_v31 = vadd.f32 %v2314_v14, %v2243_v58  ;;  %v2112_v11 = vmul.f32 0.2, %v2046_v12 }
 0x349   :  { %v2256_v7 = vmul.f32 %v3725_v26, %v2170_v21  ;;  %v2258_v41 = vmul.f32 %v3735_v2, %v2172_v0  ;;  %v2109_v42 = vmul.f32 0.2, %v3915_v33  ;;  %v2318_v39 = vadd.f32 %v2245_v24, %v3865_v57  ;;  %v2051_v21 = vpop.f32.mrf.mxu1 }
 0x34a   :  { %v1975_v36 = vpop.f32.mrf.mxu0  ;;  %2316 = vadd.xlane.f32.xlu1 %v2315_v31  ;;  %v2171_v27 = vmax.f32 %v1929_v28, %v2107_v45  ;;  %v1935_v63 = vadd.f32 %v1934_v23, %v3704_v37  ;;  %v3937_v32 = vadd.f32 %v2047_v4, %v3731_v61  ;;  %v1937_v43 = vadd.f32 %v1936_v54, %v3707_v47 }
 0x34b   :  { %v2174_v22 = vmax.f32 %v1933_v49, %v2110_v17  ;;  %v2247_v15 = vmul.f32 %v3739_v55, %v2161_v5  ;;  %v2319_v19 = vadd.f32 %v2318_v39, %v3880_v53  ;;  %v3946_v57 = vadd.f32 %v2049_v1, %v3727_v60 }
 0x34c   :  { %v1977_v24 = vpop.f32.mrf.mxu0  ;;  %v2176_v59 = vmax.f32 %v2046_v12, %v2112_v11  ;;  %v2111_v35 = vmul.f32 0.2, %v1935_v63  ;;  %v3949_v23 = vmul.f32 0.2, %v3937_v32  ;;  %v2114_v25 = vmul.f32 0.2, %v1937_v43 }
 0x34d   :  { %v2173_v47 = vmax.f32 %v3915_v33, %v2109_v42  ;;  %v2320_v56 = vadd.f32 %v2319_v19, %v2247_v15  ;;  %v3953_v40 = vmul.f32 0.2, %v3946_v57  ;;  %v2323_v3 = vadd.f32 %v2249_v6, %v3890_v34 }
 0x34e   :  { %v1979_v18 = vpop.f32.mrf.mxu0  ;;  %v2257_v53 = vmul.f32 %v3720_v20, %v2171_v27  ;;  %v2175_v5 = vmax.f32 %v1935_v63, %v2111_v35  ;;  %v2178_v46 = vmax.f32 %v1937_v43, %v2114_v25  ;;  %v1939_v4 = vadd.f32 %v1938_v10, %v3704_v37 }
 0x34f   :  { %v3959_v28 = vmul.f32 %v3725_v26, %v2174_v22  ;;  %2321 = vadd.xlane.f32.xlu0 %v2320_v56  ;;  %v2251_v33 = vmul.f32 %v3739_v55, %v2165_v30  ;;  %v2324_v49 = vadd.f32 %v2323_v3, %v3897_v8  ;;  %v1976_v34 = vadd.f32 %v1975_v36, %v3727_v60 }
 0x350   :  { %v1981_v6 = vpop.f32.mrf.mxu0  ;;  %v3968_v54 = vmul.f32 %v3735_v2, %v2176_v59  ;;  %v2177_v37 = vmax.f32 %v3937_v32, %v3949_v23  ;;  %v2180_v0 = vmax.f32 %v3946_v57, %v3953_v40  ;;  %v2115_v58 = vmul.f32 0.2, %v1939_v4  ;;  %v4016_v32 = vld [vmem:[#allocation2] ss:$0 sm:$0xff] }
 0x351   :  { %v2261_v14 = vmul.f32 %v3720_v20, %v2175_v5  ;;  %v2325_v29 = vadd.f32 %v2324_v49, %v2251_v33  ;;  %v3976_v50 = vadd.f32 %v2051_v21, %v3731_v61  ;;  %v2056_v8 = vmul.f32 0.2, %v1976_v34 }
 0x352   :  { %v1985_v30 = vpop.f32.mrf.mxu0  ;;  %v2264_v12 = vmul.f32 %v3725_v26, %v2178_v46  ;;  %v2328_v45 = vadd.f32 %v2253_v9, %v2252_v48  ;;  %v1978_v17 = vadd.f32 %v1977_v24, %v3731_v61  ;;  %v1980_v10 = vadd.f32 %v1979_v18, %v3727_v60 }
 0x353   :  { %2326 = vadd.xlane.f32.xlu1 %v2325_v29  ;;  %v2179_v31 = vmax.f32 %v1939_v4, %v2115_v58  ;;  %v2120_v11 = vmax.f32 %v1976_v34, %v2056_v8  ;;  %v2255_v1 = vmul.f32 %v3739_v55, %v2169_v44  ;;  %v2333_v42 = vadd.f32 %v2257_v53, %v2256_v7 }
 0x354   :  { %v1987_v39 = vpop.f32.mrf.mxu0  ;;  %v2329_v36 = vadd.f32 %v2328_v45, %v3926_v13  ;;  %v2057_v27 = vmul.f32 0.2, %v1978_v17  ;;  %v2060_v63 = vmul.f32 0.2, %v1980_v10  ;;  %v2259_v43 = vmul.f32 %v3739_v55, %v2173_v47 }
 0x355   :  { %v2206_v26 = vmul.f32 %v3735_v2, %v2120_v11  ;;  %v2334_v48 = vadd.f32 %v2333_v42, %v2258_v41  ;;  %v1982_v9 = vadd.f32 %v1981_v6, %v3731_v61  ;;  %v1986_v22 = vadd.f32 %v1985_v30, %v3727_v60 }
 0x356   :  { %v1989_v15 = vpop.f32.mrf.mxu0  ;;  %v2330_v19 = vadd.f32 %v2329_v36, %v2255_v1  ;;  %v2121_v24 = vmax.f32 %v1978_v17, %v2057_v27  ;;  %v2124_v59 = vmax.f32 %v1980_v10, %v2060_v63  ;;  %v1988_v44 = vadd.f32 %v1987_v39, %v3731_v61 }
 0x357   :  { %v2335_v7 = vadd.f32 %v2334_v48, %v2259_v43  ;;  %v2061_v35 = vmul.f32 0.2, %v1982_v9  ;;  %v2064_v13 = vmul.f32 0.2, %v1986_v22  ;;  %v1990_v25 = vadd.f32 %v1989_v15, %v3727_v60 }
 0x358   :  { %v1991_v56 = vpop.f32.mrf.mxu0  ;;  %2331 = vadd.xlane.f32.xlu0 %v2330_v19  ;;  %v2210_v47 = vmul.f32 %v3735_v2, %v2124_v59  ;;  %v2065_v41 = vmul.f32 0.2, %v1988_v44  ;;  %v2207_v3 = vmul.f32 %v3739_v55, %v2121_v24  ;;  %v2269_v18 = vadd.f32 %v3745_v51, %v2206_v26 }
 0x359   :  { %2336 = vadd.xlane.f32.xlu1 %v2335_v7  ;;  %v2125_v53 = vmax.f32 %v1982_v9, %v2061_v35  ;;  %v2128_v5 = vmax.f32 %v1986_v22, %v2064_v13  ;;  %v2068_v46 = vmul.f32 0.2, %v1990_v25  ;;  %v1992_v4 = vadd.f32 %v1991_v56, %v3731_v61 }
 0x35a   :  { %v2265_v21 = vmul.f32 %v3720_v20, %v2179_v31  ;;  %v2129_v33 = vmax.f32 %v1988_v44, %v2065_v41  ;;  %v2270_v49 = vadd.f32 %v2269_v18, %v2207_v3  ;;  %v2274_v60 = vadd.f32 %v3749_v62, %v2210_v47 }
 0x35b   :  { %v2214_v34 = vmul.f32 %v3735_v2, %v2128_v5  ;;  %v2132_v6 = vmax.f32 %v1990_v25, %v2068_v46  ;;  %v2069_v58 = vmul.f32 0.2, %v1992_v4  ;;  %v2211_v29 = vmul.f32 %v3739_v55, %v2125_v53 }
 0x35c   :  { %v2117_v51 = vmul.f32 0.2, %v3976_v50  ;;  %2271 = vadd.xlane.f32.xlu0 %v2270_v49  ;;  %v2215_v8 = vmul.f32 %v3739_v55, %v2129_v33  ;;  %v2338_v30 = vadd.f32 %v2261_v14, %v3959_v28  ;;  %v2283_v20 = vadd.f32 %v3774_v52, %v3752_v38 }
 0x35d   :  { %v2218_v61 = vmul.f32 %v3735_v2, %v2132_v6  ;;  %v2133_v45 = vmax.f32 %v1992_v4, %v2069_v58  ;;  %v2275_v62 = vadd.f32 %v2274_v60, %v2211_v29  ;;  %v2279_v17 = vadd.f32 %v3761_v16, %v2214_v34 }
 0x35e   :  { %v2339_v10 = vadd.f32 %v2338_v30, %v3968_v54  ;;  %v2343_v42 = vadd.f32 %v2265_v21, %v2264_v12  ;;  %v2263_v28 = vmul.f32 %v3739_v55, %v2177_v37  ;;  %v2266_v38 = vmul.f32 %v3735_v2, %v2180_v0 }
 0x35f   :  { %v2280_v31 = vadd.f32 %v2279_v17, %v2215_v8  ;;  %v2219_v11 = vmul.f32 %v3739_v55, %v2133_v45  ;;  %v2284_v1 = vadd.f32 %v2283_v20, %v2218_v61  ;;  %v2181_v16 = vmax.f32 %v3976_v50, %v2117_v51 }
 0x360   :  { %2276 = vadd.xlane.f32.xlu0 %v2275_v62  ;;  %v2340_v54 = vadd.f32 %v2339_v10, %v2263_v28  ;;  %v2344_v14 = vadd.f32 %v2343_v42, %v2266_v38 }
 0x361   :  { %2281 = vadd.xlane.f32.xlu1 %v2280_v31  ;;  %v2285_v52 = vadd.f32 %v2284_v1, %v2219_v11  ;;  %v2267_v12 = vmul.f32 %v3739_v55, %v2181_v16 }
 0x363   :  { %v2345_v39 = vadd.f32 %v2344_v14, %v2267_v12 }
 0x364   :  { %2341 = vadd.xlane.f32.xlu0 %v2340_v54 }
 0x365   :  { %2286 = vadd.xlane.f32.xlu1 %v2285_v52 }
 0x369   :  { %2346 = vadd.xlane.f32.xlu1 %v2345_v39 }
 0x3b5   :  { %v2292_v23 = vpop.xlane.xlu0 %2291 }
 0x3b6   :  { %v2359_v37 = vadd.f32 %v4016_v32, %v2292_v23 }
 0x3b8   :  { %v2375_v57 = vsub.f32 0.0, %v2359_v37 }
 0x3ba   :  { %v2395_v40 = vmul.f32 1.442695, %v2375_v57 }
 0x3bc   :  { %3101 = vpow2.f32 %v2395_v40 }
 0x3c0   :  { %v2297_v2 = vpop.xlane.xlu1 %2296 }
 0x3c1   :  { %v2360_v0 = vadd.f32 %v4016_v32, %v2297_v2 }
 0x3c3   :  { %v2376_v50 = vsub.f32 0.0, %v2360_v0 }
 0x3c5   :  { %v2397_v36 = vmul.f32 1.442695, %v2376_v50  ;;  %v2302_v27 = vpop.xlane.xlu0 %2301 }
 0x3c6   :  { %v2361_v63 = vadd.f32 %v4016_v32, %v2302_v27 }
 0x3c7   :  { %3103 = vpow2.f32 %v2397_v36 }
 0x3c8   :  { %v2377_v55 = vsub.f32 0.0, %v2361_v63 }
 0x3c9   :  { %v3102_v43 = vpop.eup %3101 }
 0x3ca   :  { %v2399_v26 = vmul.f32 1.442695, %v2377_v55  ;;  %v2307_v48 = vpop.xlane.xlu1 %2306  ;;  %v2423_v9 = vadd.f32 1.0, %v3102_v43 }
 0x3cb   :  { %v2362_v22 = vadd.f32 %v4016_v32, %v2307_v48 }
 0x3cc   :  { %3105 = vpow2.f32 %v2399_v26 }
 0x3cd   :  { %3107 = vrcp.f32 %v2423_v9  ;;  %v2378_v15 = vsub.f32 0.0, %v2362_v22 }
 0x3ce   :  { %v2312_v19 = vpop.xlane.xlu0 %2311 }
 0x3cf   :  { %v2401_v24 = vmul.f32 1.442695, %v2378_v15  ;;  %v2363_v59 = vadd.f32 %v4016_v32, %v2312_v19 }
 0x3d1   :  { %3109 = vpow2.f32 %v2401_v24  ;;  %v2379_v44 = vsub.f32 0.0, %v2363_v59 }
 0x3d3   :  { %v2403_v7 = vmul.f32 1.442695, %v2379_v44  ;;  %v2317_v35 = vpop.xlane.xlu1 %2316 }
 0x3d4   :  { %v3104_v13 = vpop.eup %3103  ;;  %v2364_v25 = vadd.f32 %v4016_v32, %v2317_v35 }
 0x3d5   :  { %v2424_v56 = vadd.f32 1.0, %v3104_v13  ;;  %3111 = vpow2.f32 %v2403_v7 }
 0x3d6   :  { %v2380_v47 = vsub.f32 0.0, %v2364_v25 }
 0x3d7   :  { %3113 = vrcp.f32 %v2424_v56 }
 0x3d8   :  { %v2405_v41 = vmul.f32 1.442695, %v2380_v47  ;;  %v2322_v3 = vpop.xlane.xlu0 %2321 }
 0x3d9   :  { %v3106_v18 = vpop.eup %3105  ;;  %v2365_v53 = vadd.f32 %v4016_v32, %v2322_v3 }
 0x3da   :  { %v3108_v5 = vpop.eup %3107  ;;  %v2425_v46 = vadd.f32 1.0, %v3106_v18  ;;  %3115 = vpow2.f32 %v2405_v41 }
 0x3db   :  { %v2381_v4 = vsub.f32 0.0, %v2365_v53 }
 0x3dc   :  { %3117 = vrcp.f32 %v2425_v46  ;;  %v2327_v21 = vpop.xlane.xlu1 %2326 }
 0x3dd   :  { %v2407_v33 = vmul.f32 1.442695, %v2381_v4  ;;  %v2366_v49 = vadd.f32 %v4016_v32, %v2327_v21 }
 0x3de   :  { %v3110_v60 = vpop.eup %3109 }
 0x3df   :  { %v2426_v34 = vadd.f32 1.0, %v3110_v60  ;;  %3119 = vpow2.f32 %v2407_v33  ;;  %v2382_v6 = vsub.f32 0.0, %v2366_v49 }
 0x3e1   :  { %3121 = vrcp.f32 %v2426_v34  ;;  %v2409_v58 = vmul.f32 1.442695, %v2382_v6  ;;  %v2332_v29 = vpop.xlane.xlu0 %2331 }
 0x3e2   :  { %v3112_v51 = vpop.eup %3111  ;;  %v2367_v8 = vadd.f32 %v4016_v32, %v2332_v29  ;;  %v2337_v30 = vpop.xlane.xlu1 %2336 }
 0x3e3   :  { %v2427_v20 = vadd.f32 1.0, %v3112_v51  ;;  %3123 = vpow2.f32 %v2409_v58  ;;  %v2368_v61 = vadd.f32 %v4016_v32, %v2337_v30 }
 0x3e4   :  { %v3114_v45 = vpop.eup %3113  ;;  %v2383_v62 = vsub.f32 0.0, %v2367_v8 }
 0x3e5   :  { %3125 = vrcp.f32 %v2427_v20  ;;  %v2384_v17 = vsub.f32 0.0, %v2368_v61  ;;  %v2272_v10 = vpop.xlane.xlu0 %2271 }
 0x3e6   :  { %v2411_v31 = vmul.f32 1.442695, %v2383_v62  ;;  %v2355_v11 = vadd.f32 %v4016_v32, %v2272_v10 }
 0x3e7   :  { %v3116_v1 = vpop.eup %3115  ;;  %v2413_v42 = vmul.f32 1.442695, %v2384_v17 }
 0x3e8   :  { %v2428_v28 = vadd.f32 1.0, %v3116_v1  ;;  %3127 = vpow2.f32 %v2411_v31  ;;  %v2371_v38 = vsub.f32 0.0, %v2355_v11 }
 0x3e9   :  { %v3118_v16 = vpop.eup %3117  ;;  %3129 = vpow2.f32 %v2413_v42  ;;  %v2277_v52 = vpop.xlane.xlu0 %2276 }
 0x3ea   :  { %3131 = vrcp.f32 %v2428_v28  ;;  %v2387_v54 = vmul.f32 1.442695, %v2371_v38  ;;  %v2356_v14 = vadd.f32 %v4016_v32, %v2277_v52  ;;  %v2282_v12 = vpop.xlane.xlu1 %2281 }
 0x3eb   :  { %v2357_v39 = vadd.f32 %v4016_v32, %v2282_v12 }
 0x3ec   :  { %v3120_v23 = vpop.eup %3119  ;;  %3133 = vpow2.f32 %v2387_v54  ;;  %v2372_v37 = vsub.f32 0.0, %v2356_v14 }
 0x3ed   :  { %v2429_v57 = vadd.f32 1.0, %v3120_v23  ;;  %v2373_v40 = vsub.f32 0.0, %v2357_v39  ;;  %v2342_v2 = vpop.xlane.xlu0 %2341 }
 0x3ee   :  { %v3122_v0 = vpop.eup %3121  ;;  %v2389_v50 = vmul.f32 1.442695, %v2372_v37  ;;  %v2369_v36 = vadd.f32 %v4016_v32, %v2342_v2  ;;  %v2287_v27 = vpop.xlane.xlu1 %2286 }
 0x3ef   :  { %3135 = vrcp.f32 %v2429_v57  ;;  %v2391_v63 = vmul.f32 1.442695, %v2373_v40  ;;  %v2358_v55 = vadd.f32 %v4016_v32, %v2287_v27 }
 0x3f0   :  { %v3124_v43 = vpop.eup %3123  ;;  %3137 = vpow2.f32 %v2389_v50  ;;  %v2385_v26 = vsub.f32 0.0, %v2369_v36 }
 0x3f1   :  { %v2430_v48 = vadd.f32 1.0, %v3124_v43  ;;  %3139 = vpow2.f32 %v2391_v63  ;;  %v2374_v9 = vsub.f32 0.0, %v2358_v55 }
 0x3f2   :  { %v3126_v22 = vpop.eup %3125  ;;  %v2415_v15 = vmul.f32 1.442695, %v2385_v26  ;;  %v2347_v19 = vpop.xlane.xlu1 %2346 }
 0x3f3   :  { %3141 = vrcp.f32 %v2430_v48  ;;  %v2393_v24 = vmul.f32 1.442695, %v2374_v9  ;;  %v2370_v59 = vadd.f32 %v4016_v32, %v2347_v19 }
 0x3f4   :  { %3143 = vpow2.f32 %v2415_v15 }
 0x3f5   :  { %v3128_v44 = vpop.eup %3127  ;;  %3145 = vpow2.f32 %v2393_v24  ;;  %v2386_v7 = vsub.f32 0.0, %v2370_v59 }
 0x3f6   :  { %v3130_v35 = vpop.eup %3129  ;;  %v2431_v13 = vadd.f32 1.0, %v3128_v44 }
 0x3f7   :  { %v3132_v25 = vpop.eup %3131  ;;  %v2432_v56 = vadd.f32 1.0, %v3130_v35  ;;  %v2417_v47 = vmul.f32 1.442695, %v2386_v7 }
 0x3f8   :  { %3147 = vrcp.f32 %v2431_v13 }
 0x3f9   :  { %v3134_v41 = vpop.eup %3133  ;;  %3149 = vrcp.f32 %v2432_v56 }
 0x3fa   :  { %v2419_v3 = vadd.f32 1.0, %v3134_v41  ;;  %3151 = vpow2.f32 %v2417_v47 }
 0x3fc   :  { %v3136_v18 = vpop.eup %3135  ;;  %3153 = vrcp.f32 %v2419_v3 }
 0x3fd   :  { %v3138_v53 = vpop.eup %3137 }
 0x3fe   :  { %v3140_v5 = vpop.eup %3139  ;;  %v2420_v46 = vadd.f32 1.0, %v3138_v53 }
 0x3ff   :  { %v2421_v32 = vadd.f32 1.0, %v3140_v5 }
 0x400   :  { %v3142_v4 = vpop.eup %3141  ;;  %3155 = vrcp.f32 %v2420_v46 }
 0x401   :  { %v3144_v21 = vpop.eup %3143  ;;  %3157 = vrcp.f32 %v2421_v32 }
 0x402   :  { %v3146_v33 = vpop.eup %3145  ;;  %v2433_v49 = vadd.f32 1.0, %v3144_v21 }
 0x403   :  { %v2422_v60 = vadd.f32 1.0, %v3146_v33 }
 0x404   :  { %3159 = vrcp.f32 %v2433_v49 }
 0x405   :  { %v3148_v34 = vpop.eup %3147  ;;  %3161 = vrcp.f32 %v2422_v60 }
 0x406   :  { %v3150_v6 = vpop.eup %3149 }
 0x407   :  { %v3152_v58 = vpop.eup %3151 }
 0x408   :  { %v2434_v29 = vadd.f32 1.0, %v3152_v58 }
 0x409   :  { %v3154_v51 = vpop.eup %3153 }
 0x40a   :  { %2468 = vst.msk [vmem:[#allocation11] sm:$0xff] %vm2467_vm1, %v3154_v51  ;;  %3163 = vrcp.f32 %v2434_v29 }
 0x40d   :  { %v3156_v8 = vpop.eup %3155 }
 0x40e   :  { %v3158_v30 = vpop.eup %3157 }
 0x411   :  { %v3160_v20 = vpop.eup %3159  ;;  %v2514_v61 = vld [vmem:[#allocation11] sm:$0xff] }
 0x412   :  { %v3162_v45 = vpop.eup %3161  ;;  %2515 = vst [vmem:[%s4047_s9] sm:$0xff] %v2514_v61 }
 0x417   :  { %v3164_v62 = vpop.eup %3163 }
 0x418   :  { %2521 = vsyncpa [#allocation4], 1 }
 0x419   :  { %2522 = vsyncpa [#allocation6], 1 }
 0x41a   :  { %2523 = vsyncpa [#allocation9], 1 }

</bundles_post_ra>
